<compile_context>
chip_gen: v6e
topology: v6e:2x2x1
jax: 0.10.0
libtpu: 0.0.40
codegen_flags: <defaults>
</compile_context>

<pallas_src>
import functools

import jax
import jax.numpy as jnp
from jax.experimental import pallas as pl
from jax.experimental.pallas import tpu as pltpu


def _slicing_kernel(d_ref, x_ref, o_ref, *, seg_n):
    # d_ref: (st, c)     directions tile
    # x_ref: (c, L)      lane-fused batch tile, L = bt * seg_n
    # o_ref: (st, L)     sorted projections (each aligned seg_n segment sorted)
    L = x_ref.shape[-1]

    # Projection: a single MXU matmul per grid step.
    # TODO(synk): for large c/S on v6e/v7x, cast operands to bf16 here (keep
    #             preferred_element_type=f32); left in f32 since the matmul is
    #             a small fraction of this sort-bound kernel.
    s = jnp.dot(d_ref[...], x_ref[...], preferred_element_type=jnp.float32)

    # Single live iota: local lane index inside each aligned length-n segment.
    lane = jax.lax.broadcasted_iota(jnp.int32, s.shape, dimension=1) & (seg_n - 1)

    # Bitonic compare-exchange network along lanes (ascending, matches
    # torch.sort).  Masks are recomputed per stage (cheap VPU ops co-issued
    # next to the 2 XLU rolls) instead of being hoisted, keeping their live
    # ranges to one stage.  Partners are lane ^ j with j < seg_n and segments
    # are aligned power-of-two blocks, so the roll wrap-around is never used.
    k = 2
    while k <= seg_n:
        j = k // 2
        while j >= 1:
            is_low = (lane & j) == 0                      # lower lane of its pair
            take_min = is_low == ((lane & k) == 0)        # asc block keeps min low
            p_up = pltpu.roll(s, shift=L - j, axis=1)     # value from lane i + j
            p_dn = pltpu.roll(s, shift=j, axis=1)         # value from lane i - j
            partner = jnp.where(is_low, p_up, p_dn)
            s = jnp.where(take_min,
                          jnp.minimum(s, partner),
                          jnp.maximum(s, partner))
            j //= 2
        k *= 2

    o_ref[...] = s  # lane-dense, unmasked f32 store


def _choose_tiles(b, c, s_dim, n, budget_bytes):
    """Pick (bt, st): lane-fused batch tile and S-row tile.

    Preference: (1) >= 2 total grid steps so both v7x TensorCores get work,
    (2) widest lane extent per block, (3) tallest S tile.  Candidates must fit
    the VMEM budget (double-buffered x / out / directions blocks, f32)."""

    def fits(bt, st):
        blk = 4 * (2 * c * bt * n + 2 * st * bt * n + 2 * st * c)
        return blk <= budget_bytes

    b_cands = [t for t in range(b, 0, -1)
               if b % t == 0 and ((t * n) % 128 == 0 or t == b)]
    s_cands = [s_dim]
    if s_dim % 8 == 0:
        s_cands += [t for t in range(s_dim - 8, 7, -8) if s_dim % t == 0]

    best = None
    for bt in b_cands:
        for st in s_cands:
            if not fits(bt, st):
                continue
            grid_len = (b // bt) * (s_dim // st)
            score = (1 if grid_len >= 2 else 0, bt * n, st)
            if best is None or score > best[0]:
                best = (score, bt, st)
    if best is None:
        raise ValueError("no (batch, slice) tiling fits the VMEM budget")
    return best[1], best[2]


def slicing_forward(x, directions, *, vmem_budget_bytes=24 * 1024 * 1024):
    """x: (b, c, h, w) f32; directions: (S, c) unit rows -> (b, S*h*w) f32."""
    b, c, h, w = x.shape
    s_dim, c_dim = directions.shape
    assert c_dim == c, "dim_slices must equal number of channels"
    n = h * w
    # TODO(synk): general h*w needs pad-with-+inf to the next power of two and
    #             a post-sort slice; demo shapes are already powers of two.
    assert n & (n - 1) == 0, "bitonic sort requires power-of-two h*w"

    bt, st = _choose_tiles(b, c, s_dim, n, vmem_budget_bytes)

    # (c, b*n): column g*n + p holds pixel p of batch g; segments stay aligned.
    x2 = jnp.transpose(x.reshape(b, c, n), (1, 0, 2)).reshape(c, b * n)

    kernel = functools.partial(_slicing_kernel, seg_n=n)
    out = pl.pallas_call(
        kernel,
        out_shape=jax.ShapeDtypeStruct((s_dim, b * n), jnp.float32),
        grid=(b // bt, s_dim // st),
        in_specs=[
            # TODO(synk): when S is untiled the directions index_map is
            #             constant; single-buffering it would halve its
            #             (already small) VMEM footprint.
            pl.BlockSpec((st, c), lambda i, j: (j, 0)),      # directions tile
            pl.BlockSpec((c, bt * n), lambda i, j: (0, i)),  # lane-fused batch tile
        ],
        out_specs=pl.BlockSpec((st, bt * n), lambda i, j: (j, i)),
        compiler_params=pltpu.CompilerParams(
            dimension_semantics=("parallel", "parallel"),
            vmem_limit_bytes=32 * 1024 * 1024,
        ),
    )(directions, x2)

    # (S, b, n) -> (b, S, n) -> (b, S*n): matches torch's sliced.view(b, -1).
    return jnp.transpose(out.reshape(s_dim, b, n), (1, 0, 2)).reshape(b, s_dim * n)


def make_directions(key, num_slices):
    """Deterministic stand-in for Slicing.update_slices(): random unit-norm rows.
    (num_slices == dim_slices == c, as required by the module's forward.)"""
    d = jax.random.normal(key, (num_slices, num_slices), dtype=jnp.float32)
    norm = jnp.sqrt(jnp.sum(jnp.square(d), axis=-1, keepdims=True))
    return d / norm


if __name__ == "__main__":
    key = jax.random.PRNGKey(0)
    k_dir, k_x = jax.random.split(key)

    b, c, h, w = 2, 4, 16, 16          # num_slices = dim_slices = c = 4
    num_slices = c

    directions = make_directions(k_dir, num_slices)
    x = jax.random.normal(k_x, (b, c, h, w), dtype=jnp.float32)

    out = jax.block_until_ready(slicing_forward(x, directions))

    # Pure-JAX reference of the PyTorch forward pass.
    ref = jnp.sort(
        jnp.einsum("sc,bcn->bsn", directions, x.reshape(b, c, h * w)), axis=-1
    ).reshape(b, -1)

    assert out.shape == (b, num_slices * h * w)
    assert jnp.allclose(out, ref, atol=1e-5, rtol=1e-5), "mismatch vs reference"
    print("KERNEL_OK")
</pallas_src>

<mosaic_0001>
module attributes {stable_mosaic.version = 11 : i64} {
  func.func @_slicing_kernel(%arg0: i32, %arg1: i32, %arg2: memref<4x4xf32, #tpu.memory_space<vmem>>, %arg3: memref<4x256xf32, #tpu.memory_space<vmem>>, %arg4: memref<4x256xf32, #tpu.memory_space<vmem>>) attributes {dimension_semantics = [#tpu.dimension_semantics<parallel>, #tpu.dimension_semantics<parallel>], iteration_bounds = array<i64: 2, 1>, scalar_prefetch = 0 : i64, scratch_operands = 0 : i64, tpu.core_type = #tpu.core_type<tc>, window_params = [{transform_indices = @transform_0, window_bounds = array<i64: 4, 4>}, {transform_indices = @transform_1, window_bounds = array<i64: 4, 256>}, {transform_indices = @transform_2, window_bounds = array<i64: 4, 256>}]} {
    %c0 = arith.constant 0 : index
    %c0_0 = arith.constant 0 : index
    %0 = vector.load %arg2[%c0, %c0_0] : memref<4x4xf32, #tpu.memory_space<vmem>>, vector<4x4xf32>
    %c0_1 = arith.constant 0 : index
    %c0_2 = arith.constant 0 : index
    %1 = vector.load %arg3[%c0_1, %c0_2] : memref<4x256xf32, #tpu.memory_space<vmem>>, vector<4x256xf32>
    %cst = arith.constant dense<0.000000e+00> : vector<4x256xf32>
    %2 = tpu.matmul %0, %1, %cst {dimension_numbers = #tpu.dot_dimension_numbers<[1], [0], [0], [1], [0, 0, 1, 1], [], []>} : vector<4x4xf32>, vector<4x256xf32>, vector<4x256xf32> -> vector<4x256xf32>
    %3 = tpu.iota {dimensions = array<i32: 1>} : vector<4x256xi32>
    %c255_i32 = arith.constant 255 : i32
    %4 = vector.broadcast %c255_i32 : i32 to vector<4x256xi32>
    %5 = arith.andi %3, %4 : vector<4x256xi32>
    %c1_i32 = arith.constant 1 : i32
    %6 = vector.broadcast %c1_i32 : i32 to vector<4x256xi32>
    %7 = arith.andi %5, %6 : vector<4x256xi32>
    %c0_i32 = arith.constant 0 : i32
    %8 = vector.broadcast %c0_i32 : i32 to vector<4x256xi32>
    %9 = arith.cmpi eq, %7, %8 : vector<4x256xi32>
    %c2_i32 = arith.constant 2 : i32
    %10 = vector.broadcast %c2_i32 : i32 to vector<4x256xi32>
    %11 = arith.andi %5, %10 : vector<4x256xi32>
    %c0_i32_3 = arith.constant 0 : i32
    %12 = vector.broadcast %c0_i32_3 : i32 to vector<4x256xi32>
    %13 = arith.cmpi eq, %11, %12 : vector<4x256xi32>
    %14 = arith.xori %9, %13 : vector<4x256xi1>
    %cst_4 = arith.constant dense<true> : vector<4x256xi1>
    %15 = arith.xori %14, %cst_4 : vector<4x256xi1>
    %c255_i32_5 = arith.constant 255 : i32
    %16 = tpu.dynamic_rotate %2 by %c255_i32_5 dim 1 : vector<4x256xf32>, i32 -> vector<4x256xf32>
    %c1_i32_6 = arith.constant 1 : i32
    %17 = tpu.dynamic_rotate %2 by %c1_i32_6 dim 1 : vector<4x256xf32>, i32 -> vector<4x256xf32>
    %18 = arith.select %9, %16, %17 : vector<4x256xi1>, vector<4x256xf32>
    %19 = arith.minimumf %2, %18 : vector<4x256xf32>
    %20 = arith.maximumf %2, %18 : vector<4x256xf32>
    %21 = arith.select %15, %19, %20 : vector<4x256xi1>, vector<4x256xf32>
    %c2_i32_7 = arith.constant 2 : i32
    %22 = vector.broadcast %c2_i32_7 : i32 to vector<4x256xi32>
    %23 = arith.andi %5, %22 : vector<4x256xi32>
    %c0_i32_8 = arith.constant 0 : i32
    %24 = vector.broadcast %c0_i32_8 : i32 to vector<4x256xi32>
    %25 = arith.cmpi eq, %23, %24 : vector<4x256xi32>
    %c4_i32 = arith.constant 4 : i32
    %26 = vector.broadcast %c4_i32 : i32 to vector<4x256xi32>
    %27 = arith.andi %5, %26 : vector<4x256xi32>
    %c0_i32_9 = arith.constant 0 : i32
    %28 = vector.broadcast %c0_i32_9 : i32 to vector<4x256xi32>
    %29 = arith.cmpi eq, %27, %28 : vector<4x256xi32>
    %30 = arith.xori %25, %29 : vector<4x256xi1>
    %cst_10 = arith.constant dense<true> : vector<4x256xi1>
    %31 = arith.xori %30, %cst_10 : vector<4x256xi1>
    %c254_i32 = arith.constant 254 : i32
    %32 = tpu.dynamic_rotate %21 by %c254_i32 dim 1 : vector<4x256xf32>, i32 -> vector<4x256xf32>
    %c2_i32_11 = arith.constant 2 : i32
    %33 = tpu.dynamic_rotate %21 by %c2_i32_11 dim 1 : vector<4x256xf32>, i32 -> vector<4x256xf32>
    %34 = arith.select %25, %32, %33 : vector<4x256xi1>, vector<4x256xf32>
    %35 = arith.minimumf %21, %34 : vector<4x256xf32>
    %36 = arith.maximumf %21, %34 : vector<4x256xf32>
    %37 = arith.select %31, %35, %36 : vector<4x256xi1>, vector<4x256xf32>
    %c1_i32_12 = arith.constant 1 : i32
    %38 = vector.broadcast %c1_i32_12 : i32 to vector<4x256xi32>
    %39 = arith.andi %5, %38 : vector<4x256xi32>
    %c0_i32_13 = arith.constant 0 : i32
    %40 = vector.broadcast %c0_i32_13 : i32 to vector<4x256xi32>
    %41 = arith.cmpi eq, %39, %40 : vector<4x256xi32>
    %c4_i32_14 = arith.constant 4 : i32
    %42 = vector.broadcast %c4_i32_14 : i32 to vector<4x256xi32>
    %43 = arith.andi %5, %42 : vector<4x256xi32>
    %c0_i32_15 = arith.constant 0 : i32
    %44 = vector.broadcast %c0_i32_15 : i32 to vector<4x256xi32>
    %45 = arith.cmpi eq, %43, %44 : vector<4x256xi32>
    %46 = arith.xori %41, %45 : vector<4x256xi1>
    %cst_16 = arith.constant dense<true> : vector<4x256xi1>
    %47 = arith.xori %46, %cst_16 : vector<4x256xi1>
    %c255_i32_17 = arith.constant 255 : i32
    %48 = tpu.dynamic_rotate %37 by %c255_i32_17 dim 1 : vector<4x256xf32>, i32 -> vector<4x256xf32>
    %c1_i32_18 = arith.constant 1 : i32
    %49 = tpu.dynamic_rotate %37 by %c1_i32_18 dim 1 : vector<4x256xf32>, i32 -> vector<4x256xf32>
    %50 = arith.select %41, %48, %49 : vector<4x256xi1>, vector<4x256xf32>
    %51 = arith.minimumf %37, %50 : vector<4x256xf32>
    %52 = arith.maximumf %37, %50 : vector<4x256xf32>
    %53 = arith.select %47, %51, %52 : vector<4x256xi1>, vector<4x256xf32>
    %c4_i32_19 = arith.constant 4 : i32
    %54 = vector.broadcast %c4_i32_19 : i32 to vector<4x256xi32>
    %55 = arith.andi %5, %54 : vector<4x256xi32>
    %c0_i32_20 = arith.constant 0 : i32
    %56 = vector.broadcast %c0_i32_20 : i32 to vector<4x256xi32>
    %57 = arith.cmpi eq, %55, %56 : vector<4x256xi32>
    %c8_i32 = arith.constant 8 : i32
    %58 = vector.broadcast %c8_i32 : i32 to vector<4x256xi32>
    %59 = arith.andi %5, %58 : vector<4x256xi32>
    %c0_i32_21 = arith.constant 0 : i32
    %60 = vector.broadcast %c0_i32_21 : i32 to vector<4x256xi32>
    %61 = arith.cmpi eq, %59, %60 : vector<4x256xi32>
    %62 = arith.xori %57, %61 : vector<4x256xi1>
    %cst_22 = arith.constant dense<true> : vector<4x256xi1>
    %63 = arith.xori %62, %cst_22 : vector<4x256xi1>
    %c252_i32 = arith.constant 252 : i32
    %64 = tpu.dynamic_rotate %53 by %c252_i32 dim 1 : vector<4x256xf32>, i32 -> vector<4x256xf32>
    %c4_i32_23 = arith.constant 4 : i32
    %65 = tpu.dynamic_rotate %53 by %c4_i32_23 dim 1 : vector<4x256xf32>, i32 -> vector<4x256xf32>
    %66 = arith.select %57, %64, %65 : vector<4x256xi1>, vector<4x256xf32>
    %67 = arith.minimumf %53, %66 : vector<4x256xf32>
    %68 = arith.maximumf %53, %66 : vector<4x256xf32>
    %69 = arith.select %63, %67, %68 : vector<4x256xi1>, vector<4x256xf32>
    %c2_i32_24 = arith.constant 2 : i32
    %70 = vector.broadcast %c2_i32_24 : i32 to vector<4x256xi32>
    %71 = arith.andi %5, %70 : vector<4x256xi32>
    %c0_i32_25 = arith.constant 0 : i32
    %72 = vector.broadcast %c0_i32_25 : i32 to vector<4x256xi32>
    %73 = arith.cmpi eq, %71, %72 : vector<4x256xi32>
    %c8_i32_26 = arith.constant 8 : i32
    %74 = vector.broadcast %c8_i32_26 : i32 to vector<4x256xi32>
    %75 = arith.andi %5, %74 : vector<4x256xi32>
    %c0_i32_27 = arith.constant 0 : i32
    %76 = vector.broadcast %c0_i32_27 : i32 to vector<4x256xi32>
    %77 = arith.cmpi eq, %75, %76 : vector<4x256xi32>
    %78 = arith.xori %73, %77 : vector<4x256xi1>
    %cst_28 = arith.constant dense<true> : vector<4x256xi1>
    %79 = arith.xori %78, %cst_28 : vector<4x256xi1>
    %c254_i32_29 = arith.constant 254 : i32
    %80 = tpu.dynamic_rotate %69 by %c254_i32_29 dim 1 : vector<4x256xf32>, i32 -> vector<4x256xf32>
    %c2_i32_30 = arith.constant 2 : i32
    %81 = tpu.dynamic_rotate %69 by %c2_i32_30 dim 1 : vector<4x256xf32>, i32 -> vector<4x256xf32>
    %82 = arith.select %73, %80, %81 : vector<4x256xi1>, vector<4x256xf32>
    %83 = arith.minimumf %69, %82 : vector<4x256xf32>
    %84 = arith.maximumf %69, %82 : vector<4x256xf32>
    %85 = arith.select %79, %83, %84 : vector<4x256xi1>, vector<4x256xf32>
    %c1_i32_31 = arith.constant 1 : i32
    %86 = vector.broadcast %c1_i32_31 : i32 to vector<4x256xi32>
    %87 = arith.andi %5, %86 : vector<4x256xi32>
    %c0_i32_32 = arith.constant 0 : i32
    %88 = vector.broadcast %c0_i32_32 : i32 to vector<4x256xi32>
    %89 = arith.cmpi eq, %87, %88 : vector<4x256xi32>
    %c8_i32_33 = arith.constant 8 : i32
    %90 = vector.broadcast %c8_i32_33 : i32 to vector<4x256xi32>
    %91 = arith.andi %5, %90 : vector<4x256xi32>
    %c0_i32_34 = arith.constant 0 : i32
    %92 = vector.broadcast %c0_i32_34 : i32 to vector<4x256xi32>
    %93 = arith.cmpi eq, %91, %92 : vector<4x256xi32>
    %94 = arith.xori %89, %93 : vector<4x256xi1>
    %cst_35 = arith.constant dense<true> : vector<4x256xi1>
    %95 = arith.xori %94, %cst_35 : vector<4x256xi1>
    %c255_i32_36 = arith.constant 255 : i32
    %96 = tpu.dynamic_rotate %85 by %c255_i32_36 dim 1 : vector<4x256xf32>, i32 -> vector<4x256xf32>
    %c1_i32_37 = arith.constant 1 : i32
    %97 = tpu.dynamic_rotate %85 by %c1_i32_37 dim 1 : vector<4x256xf32>, i32 -> vector<4x256xf32>
    %98 = arith.select %89, %96, %97 : vector<4x256xi1>, vector<4x256xf32>
    %99 = arith.minimumf %85, %98 : vector<4x256xf32>
    %100 = arith.maximumf %85, %98 : vector<4x256xf32>
    %101 = arith.select %95, %99, %100 : vector<4x256xi1>, vector<4x256xf32>
    %c8_i32_38 = arith.constant 8 : i32
    %102 = vector.broadcast %c8_i32_38 : i32 to vector<4x256xi32>
    %103 = arith.andi %5, %102 : vector<4x256xi32>
    %c0_i32_39 = arith.constant 0 : i32
    %104 = vector.broadcast %c0_i32_39 : i32 to vector<4x256xi32>
    %105 = arith.cmpi eq, %103, %104 : vector<4x256xi32>
    %c16_i32 = arith.constant 16 : i32
    %106 = vector.broadcast %c16_i32 : i32 to vector<4x256xi32>
    %107 = arith.andi %5, %106 : vector<4x256xi32>
    %c0_i32_40 = arith.constant 0 : i32
    %108 = vector.broadcast %c0_i32_40 : i32 to vector<4x256xi32>
    %109 = arith.cmpi eq, %107, %108 : vector<4x256xi32>
    %110 = arith.xori %105, %109 : vector<4x256xi1>
    %cst_41 = arith.constant dense<true> : vector<4x256xi1>
    %111 = arith.xori %110, %cst_41 : vector<4x256xi1>
    %c248_i32 = arith.constant 248 : i32
    %112 = tpu.dynamic_rotate %101 by %c248_i32 dim 1 : vector<4x256xf32>, i32 -> vector<4x256xf32>
    %c8_i32_42 = arith.constant 8 : i32
    %113 = tpu.dynamic_rotate %101 by %c8_i32_42 dim 1 : vector<4x256xf32>, i32 -> vector<4x256xf32>
    %114 = arith.select %105, %112, %113 : vector<4x256xi1>, vector<4x256xf32>
    %115 = arith.minimumf %101, %114 : vector<4x256xf32>
    %116 = arith.maximumf %101, %114 : vector<4x256xf32>
    %117 = arith.select %111, %115, %116 : vector<4x256xi1>, vector<4x256xf32>
    %c4_i32_43 = arith.constant 4 : i32
    %118 = vector.broadcast %c4_i32_43 : i32 to vector<4x256xi32>
    %119 = arith.andi %5, %118 : vector<4x256xi32>
    %c0_i32_44 = arith.constant 0 : i32
    %120 = vector.broadcast %c0_i32_44 : i32 to vector<4x256xi32>
    %121 = arith.cmpi eq, %119, %120 : vector<4x256xi32>
    %c16_i32_45 = arith.constant 16 : i32
    %122 = vector.broadcast %c16_i32_45 : i32 to vector<4x256xi32>
    %123 = arith.andi %5, %122 : vector<4x256xi32>
    %c0_i32_46 = arith.constant 0 : i32
    %124 = vector.broadcast %c0_i32_46 : i32 to vector<4x256xi32>
    %125 = arith.cmpi eq, %123, %124 : vector<4x256xi32>
    %126 = arith.xori %121, %125 : vector<4x256xi1>
    %cst_47 = arith.constant dense<true> : vector<4x256xi1>
    %127 = arith.xori %126, %cst_47 : vector<4x256xi1>
    %c252_i32_48 = arith.constant 252 : i32
    %128 = tpu.dynamic_rotate %117 by %c252_i32_48 dim 1 : vector<4x256xf32>, i32 -> vector<4x256xf32>
    %c4_i32_49 = arith.constant 4 : i32
    %129 = tpu.dynamic_rotate %117 by %c4_i32_49 dim 1 : vector<4x256xf32>, i32 -> vector<4x256xf32>
    %130 = arith.select %121, %128, %129 : vector<4x256xi1>, vector<4x256xf32>
    %131 = arith.minimumf %117, %130 : vector<4x256xf32>
    %132 = arith.maximumf %117, %130 : vector<4x256xf32>
    %133 = arith.select %127, %131, %132 : vector<4x256xi1>, vector<4x256xf32>
    %c2_i32_50 = arith.constant 2 : i32
    %134 = vector.broadcast %c2_i32_50 : i32 to vector<4x256xi32>
    %135 = arith.andi %5, %134 : vector<4x256xi32>
    %c0_i32_51 = arith.constant 0 : i32
    %136 = vector.broadcast %c0_i32_51 : i32 to vector<4x256xi32>
    %137 = arith.cmpi eq, %135, %136 : vector<4x256xi32>
    %c16_i32_52 = arith.constant 16 : i32
    %138 = vector.broadcast %c16_i32_52 : i32 to vector<4x256xi32>
    %139 = arith.andi %5, %138 : vector<4x256xi32>
    %c0_i32_53 = arith.constant 0 : i32
    %140 = vector.broadcast %c0_i32_53 : i32 to vector<4x256xi32>
    %141 = arith.cmpi eq, %139, %140 : vector<4x256xi32>
    %142 = arith.xori %137, %141 : vector<4x256xi1>
    %cst_54 = arith.constant dense<true> : vector<4x256xi1>
    %143 = arith.xori %142, %cst_54 : vector<4x256xi1>
    %c254_i32_55 = arith.constant 254 : i32
    %144 = tpu.dynamic_rotate %133 by %c254_i32_55 dim 1 : vector<4x256xf32>, i32 -> vector<4x256xf32>
    %c2_i32_56 = arith.constant 2 : i32
    %145 = tpu.dynamic_rotate %133 by %c2_i32_56 dim 1 : vector<4x256xf32>, i32 -> vector<4x256xf32>
    %146 = arith.select %137, %144, %145 : vector<4x256xi1>, vector<4x256xf32>
    %147 = arith.minimumf %133, %146 : vector<4x256xf32>
    %148 = arith.maximumf %133, %146 : vector<4x256xf32>
    %149 = arith.select %143, %147, %148 : vector<4x256xi1>, vector<4x256xf32>
    %c1_i32_57 = arith.constant 1 : i32
    %150 = vector.broadcast %c1_i32_57 : i32 to vector<4x256xi32>
    %151 = arith.andi %5, %150 : vector<4x256xi32>
    %c0_i32_58 = arith.constant 0 : i32
    %152 = vector.broadcast %c0_i32_58 : i32 to vector<4x256xi32>
    %153 = arith.cmpi eq, %151, %152 : vector<4x256xi32>
    %c16_i32_59 = arith.constant 16 : i32
    %154 = vector.broadcast %c16_i32_59 : i32 to vector<4x256xi32>
    %155 = arith.andi %5, %154 : vector<4x256xi32>
    %c0_i32_60 = arith.constant 0 : i32
    %156 = vector.broadcast %c0_i32_60 : i32 to vector<4x256xi32>
    %157 = arith.cmpi eq, %155, %156 : vector<4x256xi32>
    %158 = arith.xori %153, %157 : vector<4x256xi1>
    %cst_61 = arith.constant dense<true> : vector<4x256xi1>
    %159 = arith.xori %158, %cst_61 : vector<4x256xi1>
    %c255_i32_62 = arith.constant 255 : i32
    %160 = tpu.dynamic_rotate %149 by %c255_i32_62 dim 1 : vector<4x256xf32>, i32 -> vector<4x256xf32>
    %c1_i32_63 = arith.constant 1 : i32
    %161 = tpu.dynamic_rotate %149 by %c1_i32_63 dim 1 : vector<4x256xf32>, i32 -> vector<4x256xf32>
    %162 = arith.select %153, %160, %161 : vector<4x256xi1>, vector<4x256xf32>
    %163 = arith.minimumf %149, %162 : vector<4x256xf32>
    %164 = arith.maximumf %149, %162 : vector<4x256xf32>
    %165 = arith.select %159, %163, %164 : vector<4x256xi1>, vector<4x256xf32>
    %c16_i32_64 = arith.constant 16 : i32
    %166 = vector.broadcast %c16_i32_64 : i32 to vector<4x256xi32>
    %167 = arith.andi %5, %166 : vector<4x256xi32>
    %c0_i32_65 = arith.constant 0 : i32
    %168 = vector.broadcast %c0_i32_65 : i32 to vector<4x256xi32>
    %169 = arith.cmpi eq, %167, %168 : vector<4x256xi32>
    %c32_i32 = arith.constant 32 : i32
    %170 = vector.broadcast %c32_i32 : i32 to vector<4x256xi32>
    %171 = arith.andi %5, %170 : vector<4x256xi32>
    %c0_i32_66 = arith.constant 0 : i32
    %172 = vector.broadcast %c0_i32_66 : i32 to vector<4x256xi32>
    %173 = arith.cmpi eq, %171, %172 : vector<4x256xi32>
    %174 = arith.xori %169, %173 : vector<4x256xi1>
    %cst_67 = arith.constant dense<true> : vector<4x256xi1>
    %175 = arith.xori %174, %cst_67 : vector<4x256xi1>
    %c240_i32 = arith.constant 240 : i32
    %176 = tpu.dynamic_rotate %165 by %c240_i32 dim 1 : vector<4x256xf32>, i32 -> vector<4x256xf32>
    %c16_i32_68 = arith.constant 16 : i32
    %177 = tpu.dynamic_rotate %165 by %c16_i32_68 dim 1 : vector<4x256xf32>, i32 -> vector<4x256xf32>
    %178 = arith.select %169, %176, %177 : vector<4x256xi1>, vector<4x256xf32>
    %179 = arith.minimumf %165, %178 : vector<4x256xf32>
    %180 = arith.maximumf %165, %178 : vector<4x256xf32>
    %181 = arith.select %175, %179, %180 : vector<4x256xi1>, vector<4x256xf32>
    %c8_i32_69 = arith.constant 8 : i32
    %182 = vector.broadcast %c8_i32_69 : i32 to vector<4x256xi32>
    %183 = arith.andi %5, %182 : vector<4x256xi32>
    %c0_i32_70 = arith.constant 0 : i32
    %184 = vector.broadcast %c0_i32_70 : i32 to vector<4x256xi32>
    %185 = arith.cmpi eq, %183, %184 : vector<4x256xi32>
    %c32_i32_71 = arith.constant 32 : i32
    %186 = vector.broadcast %c32_i32_71 : i32 to vector<4x256xi32>
    %187 = arith.andi %5, %186 : vector<4x256xi32>
    %c0_i32_72 = arith.constant 0 : i32
    %188 = vector.broadcast %c0_i32_72 : i32 to vector<4x256xi32>
    %189 = arith.cmpi eq, %187, %188 : vector<4x256xi32>
    %190 = arith.xori %185, %189 : vector<4x256xi1>
    %cst_73 = arith.constant dense<true> : vector<4x256xi1>
    %191 = arith.xori %190, %cst_73 : vector<4x256xi1>
    %c248_i32_74 = arith.constant 248 : i32
    %192 = tpu.dynamic_rotate %181 by %c248_i32_74 dim 1 : vector<4x256xf32>, i32 -> vector<4x256xf32>
    %c8_i32_75 = arith.constant 8 : i32
    %193 = tpu.dynamic_rotate %181 by %c8_i32_75 dim 1 : vector<4x256xf32>, i32 -> vector<4x256xf32>
    %194 = arith.select %185, %192, %193 : vector<4x256xi1>, vector<4x256xf32>
    %195 = arith.minimumf %181, %194 : vector<4x256xf32>
    %196 = arith.maximumf %181, %194 : vector<4x256xf32>
    %197 = arith.select %191, %195, %196 : vector<4x256xi1>, vector<4x256xf32>
    %c4_i32_76 = arith.constant 4 : i32
    %198 = vector.broadcast %c4_i32_76 : i32 to vector<4x256xi32>
    %199 = arith.andi %5, %198 : vector<4x256xi32>
    %c0_i32_77 = arith.constant 0 : i32
    %200 = vector.broadcast %c0_i32_77 : i32 to vector<4x256xi32>
    %201 = arith.cmpi eq, %199, %200 : vector<4x256xi32>
    %c32_i32_78 = arith.constant 32 : i32
    %202 = vector.broadcast %c32_i32_78 : i32 to vector<4x256xi32>
    %203 = arith.andi %5, %202 : vector<4x256xi32>
    %c0_i32_79 = arith.constant 0 : i32
    %204 = vector.broadcast %c0_i32_79 : i32 to vector<4x256xi32>
    %205 = arith.cmpi eq, %203, %204 : vector<4x256xi32>
    %206 = arith.xori %201, %205 : vector<4x256xi1>
    %cst_80 = arith.constant dense<true> : vector<4x256xi1>
    %207 = arith.xori %206, %cst_80 : vector<4x256xi1>
    %c252_i32_81 = arith.constant 252 : i32
    %208 = tpu.dynamic_rotate %197 by %c252_i32_81 dim 1 : vector<4x256xf32>, i32 -> vector<4x256xf32>
    %c4_i32_82 = arith.constant 4 : i32
    %209 = tpu.dynamic_rotate %197 by %c4_i32_82 dim 1 : vector<4x256xf32>, i32 -> vector<4x256xf32>
    %210 = arith.select %201, %208, %209 : vector<4x256xi1>, vector<4x256xf32>
    %211 = arith.minimumf %197, %210 : vector<4x256xf32>
    %212 = arith.maximumf %197, %210 : vector<4x256xf32>
    %213 = arith.select %207, %211, %212 : vector<4x256xi1>, vector<4x256xf32>
    %c2_i32_83 = arith.constant 2 : i32
    %214 = vector.broadcast %c2_i32_83 : i32 to vector<4x256xi32>
    %215 = arith.andi %5, %214 : vector<4x256xi32>
    %c0_i32_84 = arith.constant 0 : i32
    %216 = vector.broadcast %c0_i32_84 : i32 to vector<4x256xi32>
    %217 = arith.cmpi eq, %215, %216 : vector<4x256xi32>
    %c32_i32_85 = arith.constant 32 : i32
    %218 = vector.broadcast %c32_i32_85 : i32 to vector<4x256xi32>
    %219 = arith.andi %5, %218 : vector<4x256xi32>
    %c0_i32_86 = arith.constant 0 : i32
    %220 = vector.broadcast %c0_i32_86 : i32 to vector<4x256xi32>
    %221 = arith.cmpi eq, %219, %220 : vector<4x256xi32>
    %222 = arith.xori %217, %221 : vector<4x256xi1>
    %cst_87 = arith.constant dense<true> : vector<4x256xi1>
    %223 = arith.xori %222, %cst_87 : vector<4x256xi1>
    %c254_i32_88 = arith.constant 254 : i32
    %224 = tpu.dynamic_rotate %213 by %c254_i32_88 dim 1 : vector<4x256xf32>, i32 -> vector<4x256xf32>
    %c2_i32_89 = arith.constant 2 : i32
    %225 = tpu.dynamic_rotate %213 by %c2_i32_89 dim 1 : vector<4x256xf32>, i32 -> vector<4x256xf32>
    %226 = arith.select %217, %224, %225 : vector<4x256xi1>, vector<4x256xf32>
    %227 = arith.minimumf %213, %226 : vector<4x256xf32>
    %228 = arith.maximumf %213, %226 : vector<4x256xf32>
    %229 = arith.select %223, %227, %228 : vector<4x256xi1>, vector<4x256xf32>
    %c1_i32_90 = arith.constant 1 : i32
    %230 = vector.broadcast %c1_i32_90 : i32 to vector<4x256xi32>
    %231 = arith.andi %5, %230 : vector<4x256xi32>
    %c0_i32_91 = arith.constant 0 : i32
    %232 = vector.broadcast %c0_i32_91 : i32 to vector<4x256xi32>
    %233 = arith.cmpi eq, %231, %232 : vector<4x256xi32>
    %c32_i32_92 = arith.constant 32 : i32
    %234 = vector.broadcast %c32_i32_92 : i32 to vector<4x256xi32>
    %235 = arith.andi %5, %234 : vector<4x256xi32>
    %c0_i32_93 = arith.constant 0 : i32
    %236 = vector.broadcast %c0_i32_93 : i32 to vector<4x256xi32>
    %237 = arith.cmpi eq, %235, %236 : vector<4x256xi32>
    %238 = arith.xori %233, %237 : vector<4x256xi1>
    %cst_94 = arith.constant dense<true> : vector<4x256xi1>
    %239 = arith.xori %238, %cst_94 : vector<4x256xi1>
    %c255_i32_95 = arith.constant 255 : i32
    %240 = tpu.dynamic_rotate %229 by %c255_i32_95 dim 1 : vector<4x256xf32>, i32 -> vector<4x256xf32>
    %c1_i32_96 = arith.constant 1 : i32
    %241 = tpu.dynamic_rotate %229 by %c1_i32_96 dim 1 : vector<4x256xf32>, i32 -> vector<4x256xf32>
    %242 = arith.select %233, %240, %241 : vector<4x256xi1>, vector<4x256xf32>
    %243 = arith.minimumf %229, %242 : vector<4x256xf32>
    %244 = arith.maximumf %229, %242 : vector<4x256xf32>
    %245 = arith.select %239, %243, %244 : vector<4x256xi1>, vector<4x256xf32>
    %c32_i32_97 = arith.constant 32 : i32
    %246 = vector.broadcast %c32_i32_97 : i32 to vector<4x256xi32>
    %247 = arith.andi %5, %246 : vector<4x256xi32>
    %c0_i32_98 = arith.constant 0 : i32
    %248 = vector.broadcast %c0_i32_98 : i32 to vector<4x256xi32>
    %249 = arith.cmpi eq, %247, %248 : vector<4x256xi32>
    %c64_i32 = arith.constant 64 : i32
    %250 = vector.broadcast %c64_i32 : i32 to vector<4x256xi32>
    %251 = arith.andi %5, %250 : vector<4x256xi32>
    %c0_i32_99 = arith.constant 0 : i32
    %252 = vector.broadcast %c0_i32_99 : i32 to vector<4x256xi32>
    %253 = arith.cmpi eq, %251, %252 : vector<4x256xi32>
    %254 = arith.xori %249, %253 : vector<4x256xi1>
    %cst_100 = arith.constant dense<true> : vector<4x256xi1>
    %255 = arith.xori %254, %cst_100 : vector<4x256xi1>
    %c224_i32 = arith.constant 224 : i32
    %256 = tpu.dynamic_rotate %245 by %c224_i32 dim 1 : vector<4x256xf32>, i32 -> vector<4x256xf32>
    %c32_i32_101 = arith.constant 32 : i32
    %257 = tpu.dynamic_rotate %245 by %c32_i32_101 dim 1 : vector<4x256xf32>, i32 -> vector<4x256xf32>
    %258 = arith.select %249, %256, %257 : vector<4x256xi1>, vector<4x256xf32>
    %259 = arith.minimumf %245, %258 : vector<4x256xf32>
    %260 = arith.maximumf %245, %258 : vector<4x256xf32>
    %261 = arith.select %255, %259, %260 : vector<4x256xi1>, vector<4x256xf32>
    %c16_i32_102 = arith.constant 16 : i32
    %262 = vector.broadcast %c16_i32_102 : i32 to vector<4x256xi32>
    %263 = arith.andi %5, %262 : vector<4x256xi32>
    %c0_i32_103 = arith.constant 0 : i32
    %264 = vector.broadcast %c0_i32_103 : i32 to vector<4x256xi32>
    %265 = arith.cmpi eq, %263, %264 : vector<4x256xi32>
    %c64_i32_104 = arith.constant 64 : i32
    %266 = vector.broadcast %c64_i32_104 : i32 to vector<4x256xi32>
    %267 = arith.andi %5, %266 : vector<4x256xi32>
    %c0_i32_105 = arith.constant 0 : i32
    %268 = vector.broadcast %c0_i32_105 : i32 to vector<4x256xi32>
    %269 = arith.cmpi eq, %267, %268 : vector<4x256xi32>
    %270 = arith.xori %265, %269 : vector<4x256xi1>
    %cst_106 = arith.constant dense<true> : vector<4x256xi1>
    %271 = arith.xori %270, %cst_106 : vector<4x256xi1>
    %c240_i32_107 = arith.constant 240 : i32
    %272 = tpu.dynamic_rotate %261 by %c240_i32_107 dim 1 : vector<4x256xf32>, i32 -> vector<4x256xf32>
    %c16_i32_108 = arith.constant 16 : i32
    %273 = tpu.dynamic_rotate %261 by %c16_i32_108 dim 1 : vector<4x256xf32>, i32 -> vector<4x256xf32>
    %274 = arith.select %265, %272, %273 : vector<4x256xi1>, vector<4x256xf32>
    %275 = arith.minimumf %261, %274 : vector<4x256xf32>
    %276 = arith.maximumf %261, %274 : vector<4x256xf32>
    %277 = arith.select %271, %275, %276 : vector<4x256xi1>, vector<4x256xf32>
    %c8_i32_109 = arith.constant 8 : i32
    %278 = vector.broadcast %c8_i32_109 : i32 to vector<4x256xi32>
    %279 = arith.andi %5, %278 : vector<4x256xi32>
    %c0_i32_110 = arith.constant 0 : i32
    %280 = vector.broadcast %c0_i32_110 : i32 to vector<4x256xi32>
    %281 = arith.cmpi eq, %279, %280 : vector<4x256xi32>
    %c64_i32_111 = arith.constant 64 : i32
    %282 = vector.broadcast %c64_i32_111 : i32 to vector<4x256xi32>
    %283 = arith.andi %5, %282 : vector<4x256xi32>
    %c0_i32_112 = arith.constant 0 : i32
    %284 = vector.broadcast %c0_i32_112 : i32 to vector<4x256xi32>
    %285 = arith.cmpi eq, %283, %284 : vector<4x256xi32>
    %286 = arith.xori %281, %285 : vector<4x256xi1>
    %cst_113 = arith.constant dense<true> : vector<4x256xi1>
    %287 = arith.xori %286, %cst_113 : vector<4x256xi1>
    %c248_i32_114 = arith.constant 248 : i32
    %288 = tpu.dynamic_rotate %277 by %c248_i32_114 dim 1 : vector<4x256xf32>, i32 -> vector<4x256xf32>
    %c8_i32_115 = arith.constant 8 : i32
    %289 = tpu.dynamic_rotate %277 by %c8_i32_115 dim 1 : vector<4x256xf32>, i32 -> vector<4x256xf32>
    %290 = arith.select %281, %288, %289 : vector<4x256xi1>, vector<4x256xf32>
    %291 = arith.minimumf %277, %290 : vector<4x256xf32>
    %292 = arith.maximumf %277, %290 : vector<4x256xf32>
    %293 = arith.select %287, %291, %292 : vector<4x256xi1>, vector<4x256xf32>
    %c4_i32_116 = arith.constant 4 : i32
    %294 = vector.broadcast %c4_i32_116 : i32 to vector<4x256xi32>
    %295 = arith.andi %5, %294 : vector<4x256xi32>
    %c0_i32_117 = arith.constant 0 : i32
    %296 = vector.broadcast %c0_i32_117 : i32 to vector<4x256xi32>
    %297 = arith.cmpi eq, %295, %296 : vector<4x256xi32>
    %c64_i32_118 = arith.constant 64 : i32
    %298 = vector.broadcast %c64_i32_118 : i32 to vector<4x256xi32>
    %299 = arith.andi %5, %298 : vector<4x256xi32>
    %c0_i32_119 = arith.constant 0 : i32
    %300 = vector.broadcast %c0_i32_119 : i32 to vector<4x256xi32>
    %301 = arith.cmpi eq, %299, %300 : vector<4x256xi32>
    %302 = arith.xori %297, %301 : vector<4x256xi1>
    %cst_120 = arith.constant dense<true> : vector<4x256xi1>
    %303 = arith.xori %302, %cst_120 : vector<4x256xi1>
    %c252_i32_121 = arith.constant 252 : i32
    %304 = tpu.dynamic_rotate %293 by %c252_i32_121 dim 1 : vector<4x256xf32>, i32 -> vector<4x256xf32>
    %c4_i32_122 = arith.constant 4 : i32
    %305 = tpu.dynamic_rotate %293 by %c4_i32_122 dim 1 : vector<4x256xf32>, i32 -> vector<4x256xf32>
    %306 = arith.select %297, %304, %305 : vector<4x256xi1>, vector<4x256xf32>
    %307 = arith.minimumf %293, %306 : vector<4x256xf32>
    %308 = arith.maximumf %293, %306 : vector<4x256xf32>
    %309 = arith.select %303, %307, %308 : vector<4x256xi1>, vector<4x256xf32>
    %c2_i32_123 = arith.constant 2 : i32
    %310 = vector.broadcast %c2_i32_123 : i32 to vector<4x256xi32>
    %311 = arith.andi %5, %310 : vector<4x256xi32>
    %c0_i32_124 = arith.constant 0 : i32
    %312 = vector.broadcast %c0_i32_124 : i32 to vector<4x256xi32>
    %313 = arith.cmpi eq, %311, %312 : vector<4x256xi32>
    %c64_i32_125 = arith.constant 64 : i32
    %314 = vector.broadcast %c64_i32_125 : i32 to vector<4x256xi32>
    %315 = arith.andi %5, %314 : vector<4x256xi32>
    %c0_i32_126 = arith.constant 0 : i32
    %316 = vector.broadcast %c0_i32_126 : i32 to vector<4x256xi32>
    %317 = arith.cmpi eq, %315, %316 : vector<4x256xi32>
    %318 = arith.xori %313, %317 : vector<4x256xi1>
    %cst_127 = arith.constant dense<true> : vector<4x256xi1>
    %319 = arith.xori %318, %cst_127 : vector<4x256xi1>
    %c254_i32_128 = arith.constant 254 : i32
    %320 = tpu.dynamic_rotate %309 by %c254_i32_128 dim 1 : vector<4x256xf32>, i32 -> vector<4x256xf32>
    %c2_i32_129 = arith.constant 2 : i32
    %321 = tpu.dynamic_rotate %309 by %c2_i32_129 dim 1 : vector<4x256xf32>, i32 -> vector<4x256xf32>
    %322 = arith.select %313, %320, %321 : vector<4x256xi1>, vector<4x256xf32>
    %323 = arith.minimumf %309, %322 : vector<4x256xf32>
    %324 = arith.maximumf %309, %322 : vector<4x256xf32>
    %325 = arith.select %319, %323, %324 : vector<4x256xi1>, vector<4x256xf32>
    %c1_i32_130 = arith.constant 1 : i32
    %326 = vector.broadcast %c1_i32_130 : i32 to vector<4x256xi32>
    %327 = arith.andi %5, %326 : vector<4x256xi32>
    %c0_i32_131 = arith.constant 0 : i32
    %328 = vector.broadcast %c0_i32_131 : i32 to vector<4x256xi32>
    %329 = arith.cmpi eq, %327, %328 : vector<4x256xi32>
    %c64_i32_132 = arith.constant 64 : i32
    %330 = vector.broadcast %c64_i32_132 : i32 to vector<4x256xi32>
    %331 = arith.andi %5, %330 : vector<4x256xi32>
    %c0_i32_133 = arith.constant 0 : i32
    %332 = vector.broadcast %c0_i32_133 : i32 to vector<4x256xi32>
    %333 = arith.cmpi eq, %331, %332 : vector<4x256xi32>
    %334 = arith.xori %329, %333 : vector<4x256xi1>
    %cst_134 = arith.constant dense<true> : vector<4x256xi1>
    %335 = arith.xori %334, %cst_134 : vector<4x256xi1>
    %c255_i32_135 = arith.constant 255 : i32
    %336 = tpu.dynamic_rotate %325 by %c255_i32_135 dim 1 : vector<4x256xf32>, i32 -> vector<4x256xf32>
    %c1_i32_136 = arith.constant 1 : i32
    %337 = tpu.dynamic_rotate %325 by %c1_i32_136 dim 1 : vector<4x256xf32>, i32 -> vector<4x256xf32>
    %338 = arith.select %329, %336, %337 : vector<4x256xi1>, vector<4x256xf32>
    %339 = arith.minimumf %325, %338 : vector<4x256xf32>
    %340 = arith.maximumf %325, %338 : vector<4x256xf32>
    %341 = arith.select %335, %339, %340 : vector<4x256xi1>, vector<4x256xf32>
    %c64_i32_137 = arith.constant 64 : i32
    %342 = vector.broadcast %c64_i32_137 : i32 to vector<4x256xi32>
    %343 = arith.andi %5, %342 : vector<4x256xi32>
    %c0_i32_138 = arith.constant 0 : i32
    %344 = vector.broadcast %c0_i32_138 : i32 to vector<4x256xi32>
    %345 = arith.cmpi eq, %343, %344 : vector<4x256xi32>
    %c128_i32 = arith.constant 128 : i32
    %346 = vector.broadcast %c128_i32 : i32 to vector<4x256xi32>
    %347 = arith.andi %5, %346 : vector<4x256xi32>
    %c0_i32_139 = arith.constant 0 : i32
    %348 = vector.broadcast %c0_i32_139 : i32 to vector<4x256xi32>
    %349 = arith.cmpi eq, %347, %348 : vector<4x256xi32>
    %350 = arith.xori %345, %349 : vector<4x256xi1>
    %cst_140 = arith.constant dense<true> : vector<4x256xi1>
    %351 = arith.xori %350, %cst_140 : vector<4x256xi1>
    %c192_i32 = arith.constant 192 : i32
    %352 = tpu.dynamic_rotate %341 by %c192_i32 dim 1 : vector<4x256xf32>, i32 -> vector<4x256xf32>
    %c64_i32_141 = arith.constant 64 : i32
    %353 = tpu.dynamic_rotate %341 by %c64_i32_141 dim 1 : vector<4x256xf32>, i32 -> vector<4x256xf32>
    %354 = arith.select %345, %352, %353 : vector<4x256xi1>, vector<4x256xf32>
    %355 = arith.minimumf %341, %354 : vector<4x256xf32>
    %356 = arith.maximumf %341, %354 : vector<4x256xf32>
    %357 = arith.select %351, %355, %356 : vector<4x256xi1>, vector<4x256xf32>
    %c32_i32_142 = arith.constant 32 : i32
    %358 = vector.broadcast %c32_i32_142 : i32 to vector<4x256xi32>
    %359 = arith.andi %5, %358 : vector<4x256xi32>
    %c0_i32_143 = arith.constant 0 : i32
    %360 = vector.broadcast %c0_i32_143 : i32 to vector<4x256xi32>
    %361 = arith.cmpi eq, %359, %360 : vector<4x256xi32>
    %c128_i32_144 = arith.constant 128 : i32
    %362 = vector.broadcast %c128_i32_144 : i32 to vector<4x256xi32>
    %363 = arith.andi %5, %362 : vector<4x256xi32>
    %c0_i32_145 = arith.constant 0 : i32
    %364 = vector.broadcast %c0_i32_145 : i32 to vector<4x256xi32>
    %365 = arith.cmpi eq, %363, %364 : vector<4x256xi32>
    %366 = arith.xori %361, %365 : vector<4x256xi1>
    %cst_146 = arith.constant dense<true> : vector<4x256xi1>
    %367 = arith.xori %366, %cst_146 : vector<4x256xi1>
    %c224_i32_147 = arith.constant 224 : i32
    %368 = tpu.dynamic_rotate %357 by %c224_i32_147 dim 1 : vector<4x256xf32>, i32 -> vector<4x256xf32>
    %c32_i32_148 = arith.constant 32 : i32
    %369 = tpu.dynamic_rotate %357 by %c32_i32_148 dim 1 : vector<4x256xf32>, i32 -> vector<4x256xf32>
    %370 = arith.select %361, %368, %369 : vector<4x256xi1>, vector<4x256xf32>
    %371 = arith.minimumf %357, %370 : vector<4x256xf32>
    %372 = arith.maximumf %357, %370 : vector<4x256xf32>
    %373 = arith.select %367, %371, %372 : vector<4x256xi1>, vector<4x256xf32>
    %c16_i32_149 = arith.constant 16 : i32
    %374 = vector.broadcast %c16_i32_149 : i32 to vector<4x256xi32>
    %375 = arith.andi %5, %374 : vector<4x256xi32>
    %c0_i32_150 = arith.constant 0 : i32
    %376 = vector.broadcast %c0_i32_150 : i32 to vector<4x256xi32>
    %377 = arith.cmpi eq, %375, %376 : vector<4x256xi32>
    %c128_i32_151 = arith.constant 128 : i32
    %378 = vector.broadcast %c128_i32_151 : i32 to vector<4x256xi32>
    %379 = arith.andi %5, %378 : vector<4x256xi32>
    %c0_i32_152 = arith.constant 0 : i32
    %380 = vector.broadcast %c0_i32_152 : i32 to vector<4x256xi32>
    %381 = arith.cmpi eq, %379, %380 : vector<4x256xi32>
    %382 = arith.xori %377, %381 : vector<4x256xi1>
    %cst_153 = arith.constant dense<true> : vector<4x256xi1>
    %383 = arith.xori %382, %cst_153 : vector<4x256xi1>
    %c240_i32_154 = arith.constant 240 : i32
    %384 = tpu.dynamic_rotate %373 by %c240_i32_154 dim 1 : vector<4x256xf32>, i32 -> vector<4x256xf32>
    %c16_i32_155 = arith.constant 16 : i32
    %385 = tpu.dynamic_rotate %373 by %c16_i32_155 dim 1 : vector<4x256xf32>, i32 -> vector<4x256xf32>
    %386 = arith.select %377, %384, %385 : vector<4x256xi1>, vector<4x256xf32>
    %387 = arith.minimumf %373, %386 : vector<4x256xf32>
    %388 = arith.maximumf %373, %386 : vector<4x256xf32>
    %389 = arith.select %383, %387, %388 : vector<4x256xi1>, vector<4x256xf32>
    %c8_i32_156 = arith.constant 8 : i32
    %390 = vector.broadcast %c8_i32_156 : i32 to vector<4x256xi32>
    %391 = arith.andi %5, %390 : vector<4x256xi32>
    %c0_i32_157 = arith.constant 0 : i32
    %392 = vector.broadcast %c0_i32_157 : i32 to vector<4x256xi32>
    %393 = arith.cmpi eq, %391, %392 : vector<4x256xi32>
    %c128_i32_158 = arith.constant 128 : i32
    %394 = vector.broadcast %c128_i32_158 : i32 to vector<4x256xi32>
    %395 = arith.andi %5, %394 : vector<4x256xi32>
    %c0_i32_159 = arith.constant 0 : i32
    %396 = vector.broadcast %c0_i32_159 : i32 to vector<4x256xi32>
    %397 = arith.cmpi eq, %395, %396 : vector<4x256xi32>
    %398 = arith.xori %393, %397 : vector<4x256xi1>
    %cst_160 = arith.constant dense<true> : vector<4x256xi1>
    %399 = arith.xori %398, %cst_160 : vector<4x256xi1>
    %c248_i32_161 = arith.constant 248 : i32
    %400 = tpu.dynamic_rotate %389 by %c248_i32_161 dim 1 : vector<4x256xf32>, i32 -> vector<4x256xf32>
    %c8_i32_162 = arith.constant 8 : i32
    %401 = tpu.dynamic_rotate %389 by %c8_i32_162 dim 1 : vector<4x256xf32>, i32 -> vector<4x256xf32>
    %402 = arith.select %393, %400, %401 : vector<4x256xi1>, vector<4x256xf32>
    %403 = arith.minimumf %389, %402 : vector<4x256xf32>
    %404 = arith.maximumf %389, %402 : vector<4x256xf32>
    %405 = arith.select %399, %403, %404 : vector<4x256xi1>, vector<4x256xf32>
    %c4_i32_163 = arith.constant 4 : i32
    %406 = vector.broadcast %c4_i32_163 : i32 to vector<4x256xi32>
    %407 = arith.andi %5, %406 : vector<4x256xi32>
    %c0_i32_164 = arith.constant 0 : i32
    %408 = vector.broadcast %c0_i32_164 : i32 to vector<4x256xi32>
    %409 = arith.cmpi eq, %407, %408 : vector<4x256xi32>
    %c128_i32_165 = arith.constant 128 : i32
    %410 = vector.broadcast %c128_i32_165 : i32 to vector<4x256xi32>
    %411 = arith.andi %5, %410 : vector<4x256xi32>
    %c0_i32_166 = arith.constant 0 : i32
    %412 = vector.broadcast %c0_i32_166 : i32 to vector<4x256xi32>
    %413 = arith.cmpi eq, %411, %412 : vector<4x256xi32>
    %414 = arith.xori %409, %413 : vector<4x256xi1>
    %cst_167 = arith.constant dense<true> : vector<4x256xi1>
    %415 = arith.xori %414, %cst_167 : vector<4x256xi1>
    %c252_i32_168 = arith.constant 252 : i32
    %416 = tpu.dynamic_rotate %405 by %c252_i32_168 dim 1 : vector<4x256xf32>, i32 -> vector<4x256xf32>
    %c4_i32_169 = arith.constant 4 : i32
    %417 = tpu.dynamic_rotate %405 by %c4_i32_169 dim 1 : vector<4x256xf32>, i32 -> vector<4x256xf32>
    %418 = arith.select %409, %416, %417 : vector<4x256xi1>, vector<4x256xf32>
    %419 = arith.minimumf %405, %418 : vector<4x256xf32>
    %420 = arith.maximumf %405, %418 : vector<4x256xf32>
    %421 = arith.select %415, %419, %420 : vector<4x256xi1>, vector<4x256xf32>
    %c2_i32_170 = arith.constant 2 : i32
    %422 = vector.broadcast %c2_i32_170 : i32 to vector<4x256xi32>
    %423 = arith.andi %5, %422 : vector<4x256xi32>
    %c0_i32_171 = arith.constant 0 : i32
    %424 = vector.broadcast %c0_i32_171 : i32 to vector<4x256xi32>
    %425 = arith.cmpi eq, %423, %424 : vector<4x256xi32>
    %c128_i32_172 = arith.constant 128 : i32
    %426 = vector.broadcast %c128_i32_172 : i32 to vector<4x256xi32>
    %427 = arith.andi %5, %426 : vector<4x256xi32>
    %c0_i32_173 = arith.constant 0 : i32
    %428 = vector.broadcast %c0_i32_173 : i32 to vector<4x256xi32>
    %429 = arith.cmpi eq, %427, %428 : vector<4x256xi32>
    %430 = arith.xori %425, %429 : vector<4x256xi1>
    %cst_174 = arith.constant dense<true> : vector<4x256xi1>
    %431 = arith.xori %430, %cst_174 : vector<4x256xi1>
    %c254_i32_175 = arith.constant 254 : i32
    %432 = tpu.dynamic_rotate %421 by %c254_i32_175 dim 1 : vector<4x256xf32>, i32 -> vector<4x256xf32>
    %c2_i32_176 = arith.constant 2 : i32
    %433 = tpu.dynamic_rotate %421 by %c2_i32_176 dim 1 : vector<4x256xf32>, i32 -> vector<4x256xf32>
    %434 = arith.select %425, %432, %433 : vector<4x256xi1>, vector<4x256xf32>
    %435 = arith.minimumf %421, %434 : vector<4x256xf32>
    %436 = arith.maximumf %421, %434 : vector<4x256xf32>
    %437 = arith.select %431, %435, %436 : vector<4x256xi1>, vector<4x256xf32>
    %c1_i32_177 = arith.constant 1 : i32
    %438 = vector.broadcast %c1_i32_177 : i32 to vector<4x256xi32>
    %439 = arith.andi %5, %438 : vector<4x256xi32>
    %c0_i32_178 = arith.constant 0 : i32
    %440 = vector.broadcast %c0_i32_178 : i32 to vector<4x256xi32>
    %441 = arith.cmpi eq, %439, %440 : vector<4x256xi32>
    %c128_i32_179 = arith.constant 128 : i32
    %442 = vector.broadcast %c128_i32_179 : i32 to vector<4x256xi32>
    %443 = arith.andi %5, %442 : vector<4x256xi32>
    %c0_i32_180 = arith.constant 0 : i32
    %444 = vector.broadcast %c0_i32_180 : i32 to vector<4x256xi32>
    %445 = arith.cmpi eq, %443, %444 : vector<4x256xi32>
    %446 = arith.xori %441, %445 : vector<4x256xi1>
    %cst_181 = arith.constant dense<true> : vector<4x256xi1>
    %447 = arith.xori %446, %cst_181 : vector<4x256xi1>
    %c255_i32_182 = arith.constant 255 : i32
    %448 = tpu.dynamic_rotate %437 by %c255_i32_182 dim 1 : vector<4x256xf32>, i32 -> vector<4x256xf32>
    %c1_i32_183 = arith.constant 1 : i32
    %449 = tpu.dynamic_rotate %437 by %c1_i32_183 dim 1 : vector<4x256xf32>, i32 -> vector<4x256xf32>
    %450 = arith.select %441, %448, %449 : vector<4x256xi1>, vector<4x256xf32>
    %451 = arith.minimumf %437, %450 : vector<4x256xf32>
    %452 = arith.maximumf %437, %450 : vector<4x256xf32>
    %453 = arith.select %447, %451, %452 : vector<4x256xi1>, vector<4x256xf32>
    %c128_i32_184 = arith.constant 128 : i32
    %454 = vector.broadcast %c128_i32_184 : i32 to vector<4x256xi32>
    %455 = arith.andi %5, %454 : vector<4x256xi32>
    %c0_i32_185 = arith.constant 0 : i32
    %456 = vector.broadcast %c0_i32_185 : i32 to vector<4x256xi32>
    %457 = arith.cmpi eq, %455, %456 : vector<4x256xi32>
    %c256_i32 = arith.constant 256 : i32
    %458 = vector.broadcast %c256_i32 : i32 to vector<4x256xi32>
    %459 = arith.andi %5, %458 : vector<4x256xi32>
    %c0_i32_186 = arith.constant 0 : i32
    %460 = vector.broadcast %c0_i32_186 : i32 to vector<4x256xi32>
    %461 = arith.cmpi eq, %459, %460 : vector<4x256xi32>
    %462 = arith.xori %457, %461 : vector<4x256xi1>
    %cst_187 = arith.constant dense<true> : vector<4x256xi1>
    %463 = arith.xori %462, %cst_187 : vector<4x256xi1>
    %c128_i32_188 = arith.constant 128 : i32
    %464 = tpu.dynamic_rotate %453 by %c128_i32_188 dim 1 : vector<4x256xf32>, i32 -> vector<4x256xf32>
    %c128_i32_189 = arith.constant 128 : i32
    %465 = tpu.dynamic_rotate %453 by %c128_i32_189 dim 1 : vector<4x256xf32>, i32 -> vector<4x256xf32>
    %466 = arith.select %457, %464, %465 : vector<4x256xi1>, vector<4x256xf32>
    %467 = arith.minimumf %453, %466 : vector<4x256xf32>
    %468 = arith.maximumf %453, %466 : vector<4x256xf32>
    %469 = arith.select %463, %467, %468 : vector<4x256xi1>, vector<4x256xf32>
    %c64_i32_190 = arith.constant 64 : i32
    %470 = vector.broadcast %c64_i32_190 : i32 to vector<4x256xi32>
    %471 = arith.andi %5, %470 : vector<4x256xi32>
    %c0_i32_191 = arith.constant 0 : i32
    %472 = vector.broadcast %c0_i32_191 : i32 to vector<4x256xi32>
    %473 = arith.cmpi eq, %471, %472 : vector<4x256xi32>
    %c256_i32_192 = arith.constant 256 : i32
    %474 = vector.broadcast %c256_i32_192 : i32 to vector<4x256xi32>
    %475 = arith.andi %5, %474 : vector<4x256xi32>
    %c0_i32_193 = arith.constant 0 : i32
    %476 = vector.broadcast %c0_i32_193 : i32 to vector<4x256xi32>
    %477 = arith.cmpi eq, %475, %476 : vector<4x256xi32>
    %478 = arith.xori %473, %477 : vector<4x256xi1>
    %cst_194 = arith.constant dense<true> : vector<4x256xi1>
    %479 = arith.xori %478, %cst_194 : vector<4x256xi1>
    %c192_i32_195 = arith.constant 192 : i32
    %480 = tpu.dynamic_rotate %469 by %c192_i32_195 dim 1 : vector<4x256xf32>, i32 -> vector<4x256xf32>
    %c64_i32_196 = arith.constant 64 : i32
    %481 = tpu.dynamic_rotate %469 by %c64_i32_196 dim 1 : vector<4x256xf32>, i32 -> vector<4x256xf32>
    %482 = arith.select %473, %480, %481 : vector<4x256xi1>, vector<4x256xf32>
    %483 = arith.minimumf %469, %482 : vector<4x256xf32>
    %484 = arith.maximumf %469, %482 : vector<4x256xf32>
    %485 = arith.select %479, %483, %484 : vector<4x256xi1>, vector<4x256xf32>
    %c32_i32_197 = arith.constant 32 : i32
    %486 = vector.broadcast %c32_i32_197 : i32 to vector<4x256xi32>
    %487 = arith.andi %5, %486 : vector<4x256xi32>
    %c0_i32_198 = arith.constant 0 : i32
    %488 = vector.broadcast %c0_i32_198 : i32 to vector<4x256xi32>
    %489 = arith.cmpi eq, %487, %488 : vector<4x256xi32>
    %c256_i32_199 = arith.constant 256 : i32
    %490 = vector.broadcast %c256_i32_199 : i32 to vector<4x256xi32>
    %491 = arith.andi %5, %490 : vector<4x256xi32>
    %c0_i32_200 = arith.constant 0 : i32
    %492 = vector.broadcast %c0_i32_200 : i32 to vector<4x256xi32>
    %493 = arith.cmpi eq, %491, %492 : vector<4x256xi32>
    %494 = arith.xori %489, %493 : vector<4x256xi1>
    %cst_201 = arith.constant dense<true> : vector<4x256xi1>
    %495 = arith.xori %494, %cst_201 : vector<4x256xi1>
    %c224_i32_202 = arith.constant 224 : i32
    %496 = tpu.dynamic_rotate %485 by %c224_i32_202 dim 1 : vector<4x256xf32>, i32 -> vector<4x256xf32>
    %c32_i32_203 = arith.constant 32 : i32
    %497 = tpu.dynamic_rotate %485 by %c32_i32_203 dim 1 : vector<4x256xf32>, i32 -> vector<4x256xf32>
    %498 = arith.select %489, %496, %497 : vector<4x256xi1>, vector<4x256xf32>
    %499 = arith.minimumf %485, %498 : vector<4x256xf32>
    %500 = arith.maximumf %485, %498 : vector<4x256xf32>
    %501 = arith.select %495, %499, %500 : vector<4x256xi1>, vector<4x256xf32>
    %c16_i32_204 = arith.constant 16 : i32
    %502 = vector.broadcast %c16_i32_204 : i32 to vector<4x256xi32>
    %503 = arith.andi %5, %502 : vector<4x256xi32>
    %c0_i32_205 = arith.constant 0 : i32
    %504 = vector.broadcast %c0_i32_205 : i32 to vector<4x256xi32>
    %505 = arith.cmpi eq, %503, %504 : vector<4x256xi32>
    %c256_i32_206 = arith.constant 256 : i32
    %506 = vector.broadcast %c256_i32_206 : i32 to vector<4x256xi32>
    %507 = arith.andi %5, %506 : vector<4x256xi32>
    %c0_i32_207 = arith.constant 0 : i32
    %508 = vector.broadcast %c0_i32_207 : i32 to vector<4x256xi32>
    %509 = arith.cmpi eq, %507, %508 : vector<4x256xi32>
    %510 = arith.xori %505, %509 : vector<4x256xi1>
    %cst_208 = arith.constant dense<true> : vector<4x256xi1>
    %511 = arith.xori %510, %cst_208 : vector<4x256xi1>
    %c240_i32_209 = arith.constant 240 : i32
    %512 = tpu.dynamic_rotate %501 by %c240_i32_209 dim 1 : vector<4x256xf32>, i32 -> vector<4x256xf32>
    %c16_i32_210 = arith.constant 16 : i32
    %513 = tpu.dynamic_rotate %501 by %c16_i32_210 dim 1 : vector<4x256xf32>, i32 -> vector<4x256xf32>
    %514 = arith.select %505, %512, %513 : vector<4x256xi1>, vector<4x256xf32>
    %515 = arith.minimumf %501, %514 : vector<4x256xf32>
    %516 = arith.maximumf %501, %514 : vector<4x256xf32>
    %517 = arith.select %511, %515, %516 : vector<4x256xi1>, vector<4x256xf32>
    %c8_i32_211 = arith.constant 8 : i32
    %518 = vector.broadcast %c8_i32_211 : i32 to vector<4x256xi32>
    %519 = arith.andi %5, %518 : vector<4x256xi32>
    %c0_i32_212 = arith.constant 0 : i32
    %520 = vector.broadcast %c0_i32_212 : i32 to vector<4x256xi32>
    %521 = arith.cmpi eq, %519, %520 : vector<4x256xi32>
    %c256_i32_213 = arith.constant 256 : i32
    %522 = vector.broadcast %c256_i32_213 : i32 to vector<4x256xi32>
    %523 = arith.andi %5, %522 : vector<4x256xi32>
    %c0_i32_214 = arith.constant 0 : i32
    %524 = vector.broadcast %c0_i32_214 : i32 to vector<4x256xi32>
    %525 = arith.cmpi eq, %523, %524 : vector<4x256xi32>
    %526 = arith.xori %521, %525 : vector<4x256xi1>
    %cst_215 = arith.constant dense<true> : vector<4x256xi1>
    %527 = arith.xori %526, %cst_215 : vector<4x256xi1>
    %c248_i32_216 = arith.constant 248 : i32
    %528 = tpu.dynamic_rotate %517 by %c248_i32_216 dim 1 : vector<4x256xf32>, i32 -> vector<4x256xf32>
    %c8_i32_217 = arith.constant 8 : i32
    %529 = tpu.dynamic_rotate %517 by %c8_i32_217 dim 1 : vector<4x256xf32>, i32 -> vector<4x256xf32>
    %530 = arith.select %521, %528, %529 : vector<4x256xi1>, vector<4x256xf32>
    %531 = arith.minimumf %517, %530 : vector<4x256xf32>
    %532 = arith.maximumf %517, %530 : vector<4x256xf32>
    %533 = arith.select %527, %531, %532 : vector<4x256xi1>, vector<4x256xf32>
    %c4_i32_218 = arith.constant 4 : i32
    %534 = vector.broadcast %c4_i32_218 : i32 to vector<4x256xi32>
    %535 = arith.andi %5, %534 : vector<4x256xi32>
    %c0_i32_219 = arith.constant 0 : i32
    %536 = vector.broadcast %c0_i32_219 : i32 to vector<4x256xi32>
    %537 = arith.cmpi eq, %535, %536 : vector<4x256xi32>
    %c256_i32_220 = arith.constant 256 : i32
    %538 = vector.broadcast %c256_i32_220 : i32 to vector<4x256xi32>
    %539 = arith.andi %5, %538 : vector<4x256xi32>
    %c0_i32_221 = arith.constant 0 : i32
    %540 = vector.broadcast %c0_i32_221 : i32 to vector<4x256xi32>
    %541 = arith.cmpi eq, %539, %540 : vector<4x256xi32>
    %542 = arith.xori %537, %541 : vector<4x256xi1>
    %cst_222 = arith.constant dense<true> : vector<4x256xi1>
    %543 = arith.xori %542, %cst_222 : vector<4x256xi1>
    %c252_i32_223 = arith.constant 252 : i32
    %544 = tpu.dynamic_rotate %533 by %c252_i32_223 dim 1 : vector<4x256xf32>, i32 -> vector<4x256xf32>
    %c4_i32_224 = arith.constant 4 : i32
    %545 = tpu.dynamic_rotate %533 by %c4_i32_224 dim 1 : vector<4x256xf32>, i32 -> vector<4x256xf32>
    %546 = arith.select %537, %544, %545 : vector<4x256xi1>, vector<4x256xf32>
    %547 = arith.minimumf %533, %546 : vector<4x256xf32>
    %548 = arith.maximumf %533, %546 : vector<4x256xf32>
    %549 = arith.select %543, %547, %548 : vector<4x256xi1>, vector<4x256xf32>
    %c2_i32_225 = arith.constant 2 : i32
    %550 = vector.broadcast %c2_i32_225 : i32 to vector<4x256xi32>
    %551 = arith.andi %5, %550 : vector<4x256xi32>
    %c0_i32_226 = arith.constant 0 : i32
    %552 = vector.broadcast %c0_i32_226 : i32 to vector<4x256xi32>
    %553 = arith.cmpi eq, %551, %552 : vector<4x256xi32>
    %c256_i32_227 = arith.constant 256 : i32
    %554 = vector.broadcast %c256_i32_227 : i32 to vector<4x256xi32>
    %555 = arith.andi %5, %554 : vector<4x256xi32>
    %c0_i32_228 = arith.constant 0 : i32
    %556 = vector.broadcast %c0_i32_228 : i32 to vector<4x256xi32>
    %557 = arith.cmpi eq, %555, %556 : vector<4x256xi32>
    %558 = arith.xori %553, %557 : vector<4x256xi1>
    %cst_229 = arith.constant dense<true> : vector<4x256xi1>
    %559 = arith.xori %558, %cst_229 : vector<4x256xi1>
    %c254_i32_230 = arith.constant 254 : i32
    %560 = tpu.dynamic_rotate %549 by %c254_i32_230 dim 1 : vector<4x256xf32>, i32 -> vector<4x256xf32>
    %c2_i32_231 = arith.constant 2 : i32
    %561 = tpu.dynamic_rotate %549 by %c2_i32_231 dim 1 : vector<4x256xf32>, i32 -> vector<4x256xf32>
    %562 = arith.select %553, %560, %561 : vector<4x256xi1>, vector<4x256xf32>
    %563 = arith.minimumf %549, %562 : vector<4x256xf32>
    %564 = arith.maximumf %549, %562 : vector<4x256xf32>
    %565 = arith.select %559, %563, %564 : vector<4x256xi1>, vector<4x256xf32>
    %c1_i32_232 = arith.constant 1 : i32
    %566 = vector.broadcast %c1_i32_232 : i32 to vector<4x256xi32>
    %567 = arith.andi %5, %566 : vector<4x256xi32>
    %c0_i32_233 = arith.constant 0 : i32
    %568 = vector.broadcast %c0_i32_233 : i32 to vector<4x256xi32>
    %569 = arith.cmpi eq, %567, %568 : vector<4x256xi32>
    %c256_i32_234 = arith.constant 256 : i32
    %570 = vector.broadcast %c256_i32_234 : i32 to vector<4x256xi32>
    %571 = arith.andi %5, %570 : vector<4x256xi32>
    %c0_i32_235 = arith.constant 0 : i32
    %572 = vector.broadcast %c0_i32_235 : i32 to vector<4x256xi32>
    %573 = arith.cmpi eq, %571, %572 : vector<4x256xi32>
    %574 = arith.xori %569, %573 : vector<4x256xi1>
    %cst_236 = arith.constant dense<true> : vector<4x256xi1>
    %575 = arith.xori %574, %cst_236 : vector<4x256xi1>
    %c255_i32_237 = arith.constant 255 : i32
    %576 = tpu.dynamic_rotate %565 by %c255_i32_237 dim 1 : vector<4x256xf32>, i32 -> vector<4x256xf32>
    %c1_i32_238 = arith.constant 1 : i32
    %577 = tpu.dynamic_rotate %565 by %c1_i32_238 dim 1 : vector<4x256xf32>, i32 -> vector<4x256xf32>
    %578 = arith.select %569, %576, %577 : vector<4x256xi1>, vector<4x256xf32>
    %579 = arith.minimumf %565, %578 : vector<4x256xf32>
    %580 = arith.maximumf %565, %578 : vector<4x256xf32>
    %581 = arith.select %575, %579, %580 : vector<4x256xi1>, vector<4x256xf32>
    %c0_239 = arith.constant 0 : index
    %c0_240 = arith.constant 0 : index
    %582 = vector.load %arg4[%c0_239, %c0_240] : memref<4x256xf32, #tpu.memory_space<vmem>>, vector<4x256xf32>
    tpu.vector_store %arg4[%c0_239, %c0_240], %581 {strides = array<i32>} : memref<4x256xf32, #tpu.memory_space<vmem>>, vector<4x256xf32>,
    return
  }
  func.func @transform_0(%arg0: i32, %arg1: i32) -> (i32, i32) {
    %c0_i32 = arith.constant 0 : i32
    %c0_i32_0 = arith.constant 0 : i32
    return %arg1, %c0_i32 : i32, i32
  }
  func.func @transform_1(%arg0: i32, %arg1: i32) -> (i32, i32) {
    %c0_i32 = arith.constant 0 : i32
    %c0_i32_0 = arith.constant 0 : i32
    return %c0_i32, %arg0 : i32, i32
  }
  func.func @transform_2(%arg0: i32, %arg1: i32) -> (i32, i32) {
    %c0_i32 = arith.constant 0 : i32
    return %arg1, %arg0 : i32, i32
  }
}

</mosaic_0001>

<bundles_post_ra>
// kernel: tpu_custom_call.1
= control target key start
LH: loop header
LB: loop body
LE: loop exit
PB: predicated region body
PF: predicated region fallthrough
CT: control target
= control target key end

     0   :  { %7 = vsyncpa [#allocation3], 0  ;;  %s2753_s0 = inlined_call_operand.hbm [shape: f32[4,4], index: 0, kind: input, shape index: {}]   ;;  %s2754_s1 = inlined_call_operand.hbm [shape: f32[4,512], index: 1, kind: input, shape index: {}]   ;;  %s2755_s2 = inlined_call_operand.hbm [shape: f32[4,512], index: 2, kind: output, shape index: {}]  }
   0x1   :  { %8 = vsyncpa [#allocation6], 0 }
   0x2   :  { %10 = vsyncpa [#allocation6 + $0x1], 0 }
   0x3   :  { %11 = vsyncpa [#allocation4], 0 }
   0x4   :  { %13 = vsyncpa [#allocation4 + $0x1], 0  ;;  %s1571_s9 = smov 0   ;;  %s1573_s10 = smov 0  }
   0x5   :  { %s1575_s11 = smov 0   ;;  %s1577_s12 = smov 0  }
   0x6   :  { %s1579_s13 = smov 0   ;;  %s1581_s14 = smov 0  }
   0x7 LB: > { %s1287_s15 = sadd.s32 4294967295, %s1536_s14   ;;  %s1288_s16 = sadd.s32 4294967294, %s1536_s14   ;;  %s1536_s14 = sphi %s1581_s14, %s19_s14   ;;  %s1532_s13 = sphi %s1579_s13, %s3036_s13   ;;  %s1528_s12 = sphi %s1577_s12, %s3035_s12   ;;  %s1524_s11 = sphi %s1575_s11, %s3034_s11   ;;  %s1520_s10 = sphi %s1573_s10, %s3033_s10   ;;  %s1516_s9 = sphi %s1571_s9, %s3032_s9  }
   0x8   : > { %p77_p0 = scmp.ne.s32.totalorder %s1520_s10, %s1516_s9  ;;  %p1605_p1 = scmp.eq.s32.totalorder %s1287_s15, 0 }
   0x9   : > { %p1609_p2 = scmp.eq.s32.totalorder %s1287_s15, 1  ;;  %p109_p3 = scmp.eq.s32.totalorder %s1288_s16, 1 }
   0xa   : > { %p1615_p4 = por %p1605_p1, %p77_p0  ;;  %p1289_p5 = scmp.ge.s32.totalorder %s1536_s14, 1 }
   0xb   : > { %p1620_p6 = por %p109_p3, %p77_p0  ;;  %p116_p7 = scmp.lt.s32.totalorder %s1536_s14, 3 }
   0xc   : > { %s2824_s19 = scalar_select %p1615_p4, 1, 0 }
   0xd   : > { %s2825_s20 = scalar_select %p1620_p6, 1, 0 }
   0xe   : > { %p1625_p8 = pnand %p1289_p5, %p116_p7  ;;  %s1538_s22 = smov [#allocation2]  }
   0xf   : > { %s131_s23 = sshll.u32 %s1538_s22, 4  ;;  %s31_s25 = sadd.s32 1, %s1532_s13  ;;  %s132_s23 = int_to_ptr.vmem [resolvable:$true] %s131_s23 }
  0x10   : > { %p1317_p10 = pneg %p1625_p8  ;;  %s64_s26 = sadd.s32 1, %s1524_s11 }
  0x11   : > { %p33_p12 = scmp.ge.s32.totalorder %s31_s25, 2  ;;  %s1409_s27 = scalar_lea.vmem %s132_s23, 64 }
  0x12   : > { %p1634_p11 = pnand %p1317_p10, %p1605_p1  ;;  %p1410_p0 = scmp.ne.s32.totalorder %s132_s23, %s1409_s27 }
  0x13   : > { %p1417_p7 = scmp.lt.s32.totalorder %s132_s23, %s132_s23  ;;  %p1418_p6 = scmp.lt.s32.totalorder %s1409_s27, %s1409_s27 }
  0x14   : > { %p1400_p13 = pneg %p1634_p11 }
  0x15   : > { %p1419_p9 = por %p1418_p6, %p1417_p7 }
  0x16   : > { %p1412_p3 = pnand %p1410_p0, %p1400_p13 }
  0x18   : > { %p1413_p5 = pneg %p1412_p3 }
  0x1a   : > { %p1420_p4 = pnand %p1419_p9, %p1413_p5 }
  0x1c   : > { %1423 = shalt.err (!%p1420_p4)
}
  0x1d   : > { %1320 = dma.hbm_to_vmem [thread:$0]  (!%p1634_p11), %s2753_s0, 64, %s132_s23, [#allocation3]  }
  0x1e   : > { %s3038_s25 = smov (%p33_p12, %s31_s25), 0  ;;  %p71_p6 = scmp.ne.s32.totalorder %s1524_s11, %s1520_s10 }
  0x1f   : > { %p72_p4 = scmp.eq.s32.totalorder %s1536_s14, 0  ;;  %s61_s30 = ssub.s32 %s1532_s13, %s3038_s25 }
  0x20   : > { %p1330_p9 = scmp.lt.s32.totalorder %s1536_s14, 2  ;;  %p62_p10 = scmp.eq.s32.totalorder %s61_s30, 0 }
  0x21   : > { %p73_p13 = por %p72_p4, %p71_p6  ;;  %p1657_p0 = por %p1609_p2, %p71_p6 }
  0x22   : > { %s142_s4 = sand.u32 1, %s1524_s11   ;;  %s1307_s7 = sshll.u32 %s1532_s13, 7 }
  0x23   : > { %s1663_s5 = scalar_select %p62_p10, %s1524_s11, %s64_s26  }
  0x24   : > { %s1292_s6 = sshll.u32 %s142_s4, 3  ;;  %s152_s16 = scalar_lea.hbm %s2754_s1, %s1307_s7 }
  0x25   : > { %s146_s22 = scalar_lea.vmem [#allocation5], %s1292_s6  ;;  %p1669_p11 = pnand %p1330_p9, %p73_p13 }
  0x26   : > { %s154_s23 = sshll.u32 %s146_s22, 4  ;;  %s143_s18 = scalar_lea.sflag [#allocation6], %s142_s4  ;;  %s155_s23 = int_to_ptr.vmem [resolvable:$true] %s154_s23 }
  0x27   : > { %p1426_p2 = pneg %p1669_p11  ;;  %s1437_s27 = scalar_lea.vmem %s155_s23, 128 }
  0x28   : > { %p1438_p12 = scmp.ne.s32.totalorder %s155_s23, %s1437_s27  ;;  %s1539_s26 = smov [#allocation5]  }
  0x29   : > { %s1442_s28 = sshll.u32 %s1539_s26, 4  ;;  %s1443_s28 = int_to_ptr.vmem [resolvable:$false] %s1442_s28 }
  0x2a   : > { %p1440_p3 = pnand %p1438_p12, %p1426_p2  ;;  %s1444_s29 = scalar_lea.vmem %s1443_s28, 256 }
  0x2b   : > { %p1445_p7 = scmp.lt.s32.totalorder %s155_s23, %s1443_s28  ;;  %p1446_p6 = scmp.lt.s32.totalorder %s1444_s29, %s1437_s27 }
  0x2c   : > { %p1441_p5 = pneg %p1440_p3 }
  0x2d   : > { %p1447_p4 = por %p1446_p6, %p1445_p7 }
  0x2f   : > { %p1448_p10 = pnand %p1447_p4, %p1441_p5 }
  0x31   : > { %1451 = shalt.err (!%p1448_p10)
}
  0x32   : > { %1324 = dma.hbm_to_vmem [thread:$0]  (!%p1669_p11), %s152_s16, 128, %s155_s23, %s143_s18  }
  0x33   : > { %163 = sbr.rel (%p1625_p8) target bundleno = 4608 (0x1200), region = 28 }
  0x38   : > { %1503 = dma.done.wait (%p1605_p1), [#allocation3], 64  }
  0x39   : > { %1505 = vsyncadd (%p1605_p1), [#allocation3], 4294967232  ;;  %s1684_s30 = sand.u32 1, %s1520_s10   ;;  %p2830_p9 = scmp.ne.s32.totalorder %s2824_s19, 0 }
  0x3a   : > { %s1297_s4 = sshll.u32 %s1684_s30, 3  ;;  %s170_s6 = scalar_lea.sflag [#allocation6], %s1684_s30 }
  0x3b   : > { %s173_s7 = scalar_lea.vmem [#allocation5], %s1297_s4 }
  0x3c   : > { %1507 = dma.done.wait (%p2830_p9), %s170_s6, 128  }
  0x3d   : > { %1509 = vsyncadd (%p2830_p9), %s170_s6, 4294967168  ;;  %v1540_v0 = vmov 0.0   ;;  %v197_v1 = vld [vmem:[%s173_s7] sm:$0xff]  ;;  %vm204_vm0 = vcmask 1043456   ;;  %v196_v3 = vld [vmem:[#allocation2] sm:$0xf]  ;;  %v280_v6 = vlaneseq }
  0x3e   : > { %273 = vmatprep.mubr.f32.mxu0 %v1540_v0  ;;  %v199_v2 = vcombine.high %v197_v1, %v197_v1  ;;  %vm200_vm1 = vcmask 31744   ;;  %s1541_s17 = smov 1   ;;  %s1542_s21 = smov 127   ;;  %v2831_v15 = vmov 0  ;;  %v2833_v16 = vmov 0 }
  0x3f   : > { %v1698_v7 = vand.u32 127, %v280_v6  ;;  %v2835_v19 = vmov 0  ;;  %v2837_v20 = vmov 0  ;;  %vm2775_vm10 = vmmov 1   ;;  %s1544_s19 = smov 126   ;;  %s1545_s8 = smov 2  }
  0x40   : > { %1299 = vmatprep.subr.msk.mxu0 %vm204_vm0, %v199_v2  ;;  %v2839_v37 = vmov 0  ;;  %v2841_v40 = vmov 0  ;;  %s1546_s15 = smov 124   ;;  %s1547_s16 = smov 4  }
  0x41   : > { %1300 = vmatpush1.msk.msra.mxu0 %vm204_vm0, %v197_v1  ;;  %v282_v8 = vadd.s32 128, %v1698_v7  ;;  %v1704_v10 = vand.u32 255, %v1698_v7  ;;  %vm2757_vm6 = vcmp.lt.s32.totalorder %v1698_v7, 1  ;;  %vm2758_vm7 = vcmp.lt.s32.totalorder %v1698_v7, 127  ;;  %s1548_s22 = smov 120   ;;  %s1549_s23 = smov 8  }
  0x42   : > { %1301 = vmatmul.mubr.msk.f32.vlgmr.msra.gmra.mxu0 %vm200_vm1, %v196_v3  ;;  %vm2762_vm15 = vcmp.lt.s32.totalorder %v1698_v7, 126  ;;  %vm2759_vm0 = vcmp.lt.s32.totalorder %v1698_v7, 2  ;;  %s1550_s24 = smov 112   ;;  %s1551_s18 = smov 16  }
  0x43   : > { %v1701_v9 = vand.u32 255, %v282_v8  ;;  %v285_v13 = vand.u32 1, %v1704_v10  ;;  %v289_v14 = vand.u32 2, %v1704_v10  ;;  %v319_v35 = vand.u32 4, %v1704_v10  ;;  %s1552_s27 = smov 96   ;;  %s1553_s26 = smov 32  }
  0x44   : > { %v373_v8 = vand.u32 8, %v1704_v10  ;;  %s1554_s28 = smov 64   ;;  %s1308_s29 = sshll.u32 %s1528_s12, 7 }
  0x45   : > { %v286_v11 = vand.u32 1, %v1701_v9  ;;  %v290_v12 = vand.u32 2, %v1701_v9  ;;  %vm1718_vm4 = vcmp.eq.s32.totalorder %v285_v13, 0  ;;  %vm1722_vm5 = vcmp.eq.s32.totalorder %v289_v14, 0  ;;  %s193_s6 = scalar_lea.vmem [#allocation7], %s1297_s4  ;;  %s1555_s12 = smov [#allocation7]  }
  0x46   : > { %v2836_v19 = vsel %vm1718_vm4, 4294967295, %v2835_v19  ;;  %v2838_v20 = vsel %vm1722_vm5, 4294967295, %v2837_v20  ;;  %vm293_vm9 = vmxor %vm1718_vm4, %vm1722_vm5  ;;  %v320_v36 = vand.u32 4, %v1701_v9  ;;  %vm1756_vm13 = vcmp.eq.s32.totalorder %v319_v35, 0  ;;  %s1192_s7 = sshll.u32 %s193_s6, 4  ;;  %s1456_s4 = sshll.u32 %s1555_s12, 4  ;;  %s1193_s7 = int_to_ptr.vmem [resolvable:$true] %s1192_s7  ;;  %s1457_s4 = int_to_ptr.vmem [resolvable:$false] %s1456_s4 }
  0x47   : > { %vm1710_vm2 = vcmp.eq.s32.totalorder %v286_v11, 0  ;;  %vm1714_vm3 = vcmp.eq.s32.totalorder %v290_v12, 0  ;;  %vm295_vm12 = vmxor %vm293_vm9, %vm2775_vm10  ;;  %v2840_v37 = vsel %vm1756_vm13, 4294967295, %v2839_v37  ;;  %v374_v11 = vand.u32 8, %v1701_v9  ;;  %p1459_p11 = scmp.lt.s32.totalorder %s1193_s7, %s1457_s4 }
  0x48   : > { %v2832_v15 = vsel %vm1710_vm2, 4294967295, %v2831_v15  ;;  %v2834_v16 = vsel %vm1714_vm3, 4294967295, %v2833_v16  ;;  %vm294_vm8 = vmxor %vm1710_vm2, %vm1714_vm3  ;;  %vm1760_vm14 = vcmp.eq.s32.totalorder %v320_v36, 0  ;;  %v2843_v12 = vmov 0 }
  0x49   : > { %vm296_vm11 = vmxor %vm294_vm8, %vm2775_vm10  ;;  %v2842_v40 = vsel %vm1760_vm14, 4294967295, %v2841_v40 }
  0x4a   : > { %vm323_vm1 = vmxor %vm1722_vm5, %vm1756_vm13 }
  0x4b   : > { %vm324_vm8 = vmxor %vm1714_vm3, %vm1760_vm14 }
  0x4c   : > { %vm325_vm9 = vmxor %vm323_vm1, %vm2775_vm10 }
  0x4d   : > { %vm350_vm1 = vmxor %vm1710_vm2, %vm1760_vm14 }
 0x102   : > { %v275_v4 = vpop.f32.mrf.mxu0 }
 0x103   : > { %304 = vrot.lane.b32.xlu1 %v275_v4, %s1541_s17  ;;  %297 = vrot.lane.b32.xlu0 %v275_v4, %s1542_s21 }
 0x104   : > { %v277_v5 = vpop.f32.mrf.mxu0 }
 0x107   : > { %306 = vrot.lane.b32.xlu1 %v277_v5, %s1541_s17  ;;  %299 = vrot.lane.b32.xlu0 %v277_v5, %s1542_s21 }
 0x175   : > { %v305_v17 = vpop.permute.xlu1 %304  ;;  %v298_v18 = vpop.permute.xlu0 %297 }
 0x179   : > { %v307_v21 = vpop.permute.xlu1 %306  ;;  %v300_v22 = vpop.permute.xlu0 %299 }
 0x17a   : > { %v309_v23 = vsel %vm2757_vm6, %v305_v17, %v307_v21  ;;  %v310_v24 = vsel %vm2757_vm6, %v307_v21, %v305_v17  ;;  %v302_v25 = vsel %vm2758_vm7, %v298_v18, %v300_v22  ;;  %v303_v26 = vsel %vm2758_vm7, %v300_v22, %v298_v18 }
 0x17b   : > { %v311_v27 = vsel %vm1718_vm4, %v302_v25, %v310_v24  ;;  %v312_v28 = vsel %vm1710_vm2, %v303_v26, %v309_v23  ;;  %v2845_v17 = vmov 0 }
 0x17c   : > { %v313_v29 = vmin.f32 %v275_v4, %v311_v27  ;;  %v314_v30 = vmin.f32 %v277_v5, %v312_v28  ;;  %v315_v31 = vmax.f32 %v275_v4, %v311_v27  ;;  %v316_v32 = vmax.f32 %v277_v5, %v312_v28 }
 0x17e   : > { %v318_v33 = vsel %vm296_vm11, %v314_v30, %v316_v32  ;;  %v317_v34 = vsel %vm295_vm12, %v313_v29, %v315_v31  ;;  %vm326_vm11 = vmxor %vm324_vm8, %vm2775_vm10 }
 0x17f   : > { %329 = vrot.lane.b32.xlu1 %v318_v33, %s1544_s19  ;;  %327 = vrot.lane.b32.xlu0 %v317_v34, %s1544_s19  ;;  %vm349_vm12 = vmxor %vm1718_vm4, %vm1756_vm13 }
 0x180   : > { %vm351_vm8 = vmxor %vm349_vm12, %vm2775_vm10  ;;  %vm1824_vm12 = vcmp.eq.s32.totalorder %v374_v11, 0 }
 0x181   : > { %v2846_v17 = vsel %vm1824_vm12, 4294967295, %v2845_v17 }
 0x183   : > { %336 = vrot.lane.b32.xlu1 %v318_v33, %s1545_s8  ;;  %334 = vrot.lane.b32.xlu0 %v317_v34, %s1545_s8 }
 0x1f1   : > { %v330_v38 = vpop.permute.xlu1 %329  ;;  %v328_v39 = vpop.permute.xlu0 %327 }
 0x1f2   : > { %v332_v43 = vsel %vm2762_vm15, %v328_v39, %v330_v38  ;;  %v333_v44 = vsel %vm2762_vm15, %v330_v38, %v328_v39 }
 0x1f5   : > { %v337_v41 = vpop.permute.xlu1 %336  ;;  %v335_v42 = vpop.permute.xlu0 %334 }
 0x1f6   : > { %v339_v45 = vsel %vm2759_vm0, %v335_v42, %v337_v41  ;;  %v340_v46 = vsel %vm2759_vm0, %v337_v41, %v335_v42 }
 0x1f7   : > { %v341_v47 = vsel %vm1722_vm5, %v332_v43, %v340_v46  ;;  %v342_v48 = vsel %vm1714_vm3, %v333_v44, %v339_v45 }
 0x1f8   : > { %v343_v49 = vmin.f32 %v317_v34, %v341_v47  ;;  %v344_v50 = vmin.f32 %v318_v33, %v342_v48  ;;  %v345_v51 = vmax.f32 %v317_v34, %v341_v47  ;;  %v346_v52 = vmax.f32 %v318_v33, %v342_v48 }
 0x1fa   : > { %v347_v53 = vsel %vm325_vm9, %v343_v49, %v345_v51  ;;  %v348_v54 = vsel %vm326_vm11, %v344_v50, %v346_v52  ;;  %vm352_vm9 = vmxor %vm350_vm1, %vm2775_vm10  ;;  %vm1820_vm11 = vcmp.eq.s32.totalorder %v373_v8, 0  ;;  %vm2761_vm1 = vcmp.lt.s32.totalorder %v1698_v7, 124 }
 0x1fb   : > { %353 = vrot.lane.b32.xlu0 %v347_v53, %s1542_s21  ;;  %355 = vrot.lane.b32.xlu1 %v348_v54, %s1542_s21  ;;  %v2844_v12 = vsel %vm1820_vm11, 4294967295, %v2843_v12 }
 0x1ff   : > { %359 = vrot.lane.b32.xlu0 %v347_v53, %s1541_s17  ;;  %361 = vrot.lane.b32.xlu1 %v348_v54, %s1541_s17 }
 0x26d   : > { %v354_v55 = vpop.permute.xlu0 %353  ;;  %v356_v56 = vpop.permute.xlu1 %355 }
 0x26e   : > { %v357_v59 = vsel %vm2758_vm7, %v354_v55, %v356_v56  ;;  %v358_v60 = vsel %vm2758_vm7, %v356_v56, %v354_v55 }
 0x271   : > { %v360_v57 = vpop.permute.xlu0 %359  ;;  %v362_v58 = vpop.permute.xlu1 %361 }
 0x272   : > { %v363_v61 = vsel %vm2757_vm6, %v360_v57, %v362_v58  ;;  %v364_v62 = vsel %vm2757_vm6, %v362_v58, %v360_v57  ;;  %vm378_vm6 = vmxor %vm1760_vm14, %vm1824_vm12 }
 0x273   : > { %v365_v63 = vsel %vm1718_vm4, %v357_v59, %v364_v62  ;;  %v366_v0 = vsel %vm1710_vm2, %v358_v60, %v363_v61  ;;  %vm380_vm0 = vmxor %vm378_vm6, %vm2775_vm10 }
 0x274   : > { %v367_v1 = vmin.f32 %v347_v53, %v365_v63  ;;  %v368_v2 = vmin.f32 %v348_v54, %v366_v0  ;;  %v369_v3 = vmax.f32 %v347_v53, %v365_v63  ;;  %v370_v4 = vmax.f32 %v348_v54, %v366_v0  ;;  %vm403_vm6 = vmxor %vm1722_vm5, %vm1820_vm11 }
 0x276   : > { %v371_v5 = vsel %vm351_vm8, %v367_v1, %v369_v3  ;;  %v372_v6 = vsel %vm352_vm9, %v368_v2, %v370_v4  ;;  %vm2760_vm8 = vcmp.lt.s32.totalorder %v1698_v7, 4  ;;  %vm377_vm9 = vmxor %vm1756_vm13, %vm1820_vm11  ;;  %v451_v4 = vand.u32 16, %v1704_v10 }
 0x277   : > { %381 = vrot.lane.b32.xlu0 %v371_v5, %s1546_s15  ;;  %383 = vrot.lane.b32.xlu1 %v372_v6, %s1546_s15  ;;  %vm379_vm7 = vmxor %vm377_vm9, %vm2775_vm10 }
 0x27b   : > { %388 = vrot.lane.b32.xlu0 %v371_v5, %s1547_s16  ;;  %390 = vrot.lane.b32.xlu1 %v372_v6, %s1547_s16 }
 0x2e9   : > { %v382_v13 = vpop.permute.xlu0 %381  ;;  %v384_v14 = vpop.permute.xlu1 %383 }
 0x2ea   : > { %v386_v22 = vsel %vm2761_vm1, %v382_v13, %v384_v14  ;;  %v387_v23 = vsel %vm2761_vm1, %v384_v14, %v382_v13  ;;  %v2855_v13 = vmov 0 }
 0x2ed   : > { %v389_v18 = vpop.permute.xlu0 %388  ;;  %v391_v21 = vpop.permute.xlu1 %390 }
 0x2ee   : > { %v393_v24 = vsel %vm2760_vm8, %v389_v18, %v391_v21  ;;  %v394_v25 = vsel %vm2760_vm8, %v391_v21, %v389_v18  ;;  %vm405_vm8 = vmxor %vm403_vm6, %vm2775_vm10 }
 0x2ef   : > { %v395_v26 = vsel %vm1756_vm13, %v386_v22, %v394_v25  ;;  %v396_v27 = vsel %vm1760_vm14, %v387_v23, %v393_v24  ;;  %vm427_vm6 = vmxor %vm1718_vm4, %vm1820_vm11 }
 0x2f0   : > { %v397_v28 = vmin.f32 %v371_v5, %v395_v26  ;;  %v398_v29 = vmin.f32 %v372_v6, %v396_v27  ;;  %v399_v30 = vmax.f32 %v371_v5, %v395_v26  ;;  %v400_v31 = vmax.f32 %v372_v6, %v396_v27 }
 0x2f1   : > { %v452_v5 = vand.u32 16, %v1701_v9  ;;  %v2853_v6 = vmov 0 }
 0x2f2   : > { %v401_v32 = vsel %vm379_vm7, %v397_v28, %v399_v30  ;;  %v402_v33 = vsel %vm380_vm0, %v398_v29, %v400_v31  ;;  %vm404_vm7 = vmxor %vm1714_vm3, %vm1824_vm12  ;;  %vm2847_vm0 = vcmp.lt.s32.totalorder %v1698_v7, 2 }
 0x2f3   : > { %407 = vrot.lane.b32.xlu0 %v401_v32, %s1544_s19  ;;  %409 = vrot.lane.b32.xlu1 %v402_v33, %s1544_s19  ;;  %vm2848_vm9 = vmmov %vm2847_vm0 }
 0x2f4   : > { %vm406_vm1 = vmxor %vm404_vm7, %vm2775_vm10 }
 0x2f7   : > { %413 = vrot.lane.b32.xlu0 %v401_v32, %s1545_s8  ;;  %415 = vrot.lane.b32.xlu1 %v402_v33, %s1545_s8 }
 0x365   : > { %v408_v34 = vpop.permute.xlu0 %407  ;;  %v410_v35 = vpop.permute.xlu1 %409 }
 0x366   : > { %v411_v39 = vsel %vm2762_vm15, %v408_v34, %v410_v35  ;;  %v412_v41 = vsel %vm2762_vm15, %v410_v35, %v408_v34  ;;  %vm429_vm15 = vmxor %vm427_vm6, %vm2775_vm10  ;;  %vm1910_vm6 = vcmp.eq.s32.totalorder %v451_v4, 0 }
 0x367   : > { %v2854_v6 = vsel %vm1910_vm6, 4294967295, %v2853_v6 }
 0x369   : > { %v414_v36 = vpop.permute.xlu0 %413  ;;  %v416_v38 = vpop.permute.xlu1 %415 }
 0x36a   : > { %v417_v42 = vsel %vm2847_vm0, %v414_v36, %v416_v38  ;;  %v418_v43 = vsel %vm2848_vm9, %v416_v38, %v414_v36  ;;  %vm2851_vm0 = vcmp.lt.s32.totalorder %v1698_v7, 1 }
 0x36b   : > { %v419_v44 = vsel %vm1722_vm5, %v411_v39, %v418_v43  ;;  %v420_v45 = vsel %vm1714_vm3, %v412_v41, %v417_v42  ;;  %vm2852_vm9 = vmmov %vm2851_vm0 }
 0x36c   : > { %v421_v46 = vmin.f32 %v401_v32, %v419_v44  ;;  %v422_v47 = vmin.f32 %v402_v33, %v420_v45  ;;  %v423_v48 = vmax.f32 %v401_v32, %v419_v44  ;;  %v424_v49 = vmax.f32 %v402_v33, %v420_v45 }
 0x36e   : > { %v425_v50 = vsel %vm405_vm8, %v421_v46, %v423_v48  ;;  %v426_v51 = vsel %vm406_vm1, %v422_v47, %v424_v49  ;;  %vm428_vm1 = vmxor %vm1710_vm2, %vm1824_vm12  ;;  %vm2849_vm8 = vcmp.lt.s32.totalorder %v1698_v7, 127 }
 0x36f   : > { %431 = vrot.lane.b32.xlu0 %v425_v50, %s1542_s21  ;;  %433 = vrot.lane.b32.xlu1 %v426_v51, %s1542_s21  ;;  %vm2850_vm7 = vmmov %vm2849_vm8 }
 0x370   : > { %vm430_vm3 = vmxor %vm428_vm1, %vm2775_vm10  ;;  %vm2765_vm1 = vcmp.lt.s32.totalorder %v1698_v7, 8 }
 0x373   : > { %437 = vrot.lane.b32.xlu0 %v425_v50, %s1541_s17  ;;  %439 = vrot.lane.b32.xlu1 %v426_v51, %s1541_s17 }
 0x3e1   : > { %v432_v52 = vpop.permute.xlu0 %431  ;;  %v434_v53 = vpop.permute.xlu1 %433 }
 0x3e2   : > { %v435_v56 = vsel %vm2849_vm8, %v432_v52, %v434_v53  ;;  %v436_v57 = vsel %vm2850_vm7, %v434_v53, %v432_v52  ;;  %vm455_vm8 = vmxor %vm1820_vm11, %vm1910_vm6 }
 0x3e5   : > { %v438_v54 = vpop.permute.xlu0 %437  ;;  %v440_v55 = vpop.permute.xlu1 %439 }
 0x3e6   : > { %v441_v58 = vsel %vm2851_vm0, %v438_v54, %v440_v55  ;;  %v442_v59 = vsel %vm2852_vm9, %v440_v55, %v438_v54  ;;  %vm457_vm0 = vmxor %vm455_vm8, %vm2775_vm10 }
 0x3e7   : > { %v443_v60 = vsel %vm1718_vm4, %v435_v56, %v442_v59  ;;  %v444_v61 = vsel %vm1710_vm2, %v436_v57, %v441_v58  ;;  %vm481_vm8 = vmxor %vm1756_vm13, %vm1910_vm6 }
 0x3e8   : > { %v445_v62 = vmin.f32 %v425_v50, %v443_v60  ;;  %v446_v63 = vmin.f32 %v426_v51, %v444_v61  ;;  %v447_v0 = vmax.f32 %v425_v50, %v443_v60  ;;  %v448_v1 = vmax.f32 %v426_v51, %v444_v61 }
 0x3ea   : > { %v449_v2 = vsel %vm429_vm15, %v445_v62, %v447_v0  ;;  %v450_v3 = vsel %vm430_vm3, %v446_v63, %v448_v1  ;;  %vm1914_vm3 = vcmp.eq.s32.totalorder %v452_v5, 0  ;;  %vm2766_vm15 = vcmp.lt.s32.totalorder %v1698_v7, 120 }
 0x3eb   : > { %459 = vrot.lane.b32.xlu0 %v449_v2, %s1548_s22  ;;  %461 = vrot.lane.b32.xlu1 %v450_v3, %s1548_s22  ;;  %v2856_v13 = vsel %vm1914_vm3, 4294967295, %v2855_v13  ;;  %vm456_vm7 = vmxor %vm1824_vm12, %vm1914_vm3 }
 0x3ec   : > { %vm458_vm9 = vmxor %vm456_vm7, %vm2775_vm10 }
 0x3ed   : > { %vm482_vm7 = vmxor %vm1760_vm14, %vm1914_vm3 }
 0x3ef   : > { %466 = vrot.lane.b32.xlu0 %v449_v2, %s1549_s23  ;;  %468 = vrot.lane.b32.xlu1 %v450_v3, %s1549_s23 }
 0x45d   : > { %v460_v8 = vpop.permute.xlu0 %459  ;;  %v462_v11 = vpop.permute.xlu1 %461 }
 0x45e   : > { %v464_v21 = vsel %vm2766_vm15, %v460_v8, %v462_v11  ;;  %v465_v22 = vsel %vm2766_vm15, %v462_v11, %v460_v8 }
 0x461   : > { %v467_v14 = vpop.permute.xlu0 %466  ;;  %v469_v18 = vpop.permute.xlu1 %468 }
 0x462   : > { %v471_v23 = vsel %vm2765_vm1, %v467_v14, %v469_v18  ;;  %v472_v24 = vsel %vm2765_vm1, %v469_v18, %v467_v14  ;;  %vm2859_vm1 = vcmp.lt.s32.totalorder %v1698_v7, 4 }
 0x463   : > { %v473_v25 = vsel %vm1820_vm11, %v464_v21, %v472_v24  ;;  %v474_v26 = vsel %vm1824_vm12, %v465_v22, %v471_v23  ;;  %vm2860_vm15 = vmmov %vm2859_vm1 }
 0x464   : > { %v475_v27 = vmin.f32 %v449_v2, %v473_v25  ;;  %v476_v28 = vmin.f32 %v450_v3, %v474_v26  ;;  %v477_v29 = vmax.f32 %v449_v2, %v473_v25  ;;  %v478_v30 = vmax.f32 %v450_v3, %v474_v26  ;;  %vm483_vm12 = vmxor %vm481_vm8, %vm2775_vm10 }
 0x465   : > { %vm484_vm11 = vmxor %vm482_vm7, %vm2775_vm10  ;;  %vm2864_vm7 = vcmp.lt.s32.totalorder %v1698_v7, 2 }
 0x466   : > { %v479_v31 = vsel %vm457_vm0, %v475_v27, %v477_v29  ;;  %v480_v32 = vsel %vm458_vm9, %v476_v28, %v478_v30  ;;  %vm2857_vm0 = vcmp.lt.s32.totalorder %v1698_v7, 124  ;;  %v553_v30 = vand.u32 32, %v1704_v10 }
 0x467   : > { %485 = vrot.lane.b32.xlu0 %v479_v31, %s1546_s15  ;;  %487 = vrot.lane.b32.xlu1 %v480_v32, %s1546_s15  ;;  %vm2858_vm9 = vmmov %vm2857_vm0 }
 0x46b   : > { %491 = vrot.lane.b32.xlu0 %v479_v31, %s1547_s16  ;;  %493 = vrot.lane.b32.xlu1 %v480_v32, %s1547_s16 }
 0x4d9   : > { %v486_v33 = vpop.permute.xlu0 %485  ;;  %v488_v34 = vpop.permute.xlu1 %487 }
 0x4da   : > { %v489_v38 = vsel %vm2857_vm0, %v486_v33, %v488_v34  ;;  %v490_v39 = vsel %vm2858_vm9, %v488_v34, %v486_v33  ;;  %vm2865_vm0 = vmmov %vm2864_vm7 }
 0x4dd   : > { %v492_v35 = vpop.permute.xlu0 %491  ;;  %v494_v36 = vpop.permute.xlu1 %493 }
 0x4de   : > { %v495_v41 = vsel %vm2859_vm1, %v492_v35, %v494_v36  ;;  %v496_v42 = vsel %vm2860_vm15, %v494_v36, %v492_v35  ;;  %vm505_vm15 = vmxor %vm1722_vm5, %vm1910_vm6  ;;  %vm2862_vm1 = vcmp.lt.s32.totalorder %v1698_v7, 126  ;;  %v2872_v35 = vmov 0 }
 0x4df   : > { %v497_v43 = vsel %vm1756_vm13, %v489_v38, %v496_v42  ;;  %v498_v44 = vsel %vm1760_vm14, %v490_v39, %v495_v41  ;;  %vm2863_vm8 = vmmov %vm2862_vm1 }
 0x4e0   : > { %v499_v45 = vmin.f32 %v479_v31, %v497_v43  ;;  %v500_v46 = vmin.f32 %v480_v32, %v498_v44  ;;  %v501_v47 = vmax.f32 %v479_v31, %v497_v43  ;;  %v502_v48 = vmax.f32 %v480_v32, %v498_v44  ;;  %vm507_vm9 = vmxor %vm505_vm15, %vm2775_vm10 }
 0x4e1   : > { %vm529_vm15 = vmxor %vm1718_vm4, %vm1910_vm6  ;;  %v554_v31 = vand.u32 32, %v1701_v9  ;;  %v2870_v32 = vmov 0 }
 0x4e2   : > { %v503_v49 = vsel %vm483_vm12, %v499_v45, %v501_v47  ;;  %v504_v50 = vsel %vm484_vm11, %v500_v46, %v502_v48  ;;  %vm2861_vm12 = vnez %v2834_v16 }
 0x4e3   : > { %509 = vrot.lane.b32.xlu0 %v503_v49, %s1544_s19  ;;  %511 = vrot.lane.b32.xlu1 %v504_v50, %s1544_s19  ;;  %vm506_vm11 = vmxor %vm2861_vm12, %vm1914_vm3 }
 0x4e4   : > { %vm508_vm14 = vmxor %vm506_vm11, %vm2775_vm10  ;;  %vm2866_vm11 = vcmp.lt.s32.totalorder %v1698_v7, 127 }
 0x4e7   : > { %515 = vrot.lane.b32.xlu0 %v503_v49, %s1545_s8  ;;  %517 = vrot.lane.b32.xlu1 %v504_v50, %s1545_s8 }
 0x555   : > { %v510_v51 = vpop.permute.xlu0 %509  ;;  %v512_v52 = vpop.permute.xlu1 %511 }
 0x556   : > { %v513_v55 = vsel %vm2862_vm1, %v510_v51, %v512_v52  ;;  %v514_v56 = vsel %vm2863_vm8, %v512_v52, %v510_v51  ;;  %vm2867_vm1 = vmmov %vm2866_vm11  ;;  %vm2868_vm8 = vcmp.lt.s32.totalorder %v1698_v7, 1 }
 0x559   : > { %v516_v53 = vpop.permute.xlu0 %515  ;;  %v518_v54 = vpop.permute.xlu1 %517 }
 0x55a   : > { %v519_v57 = vsel %vm2864_vm7, %v516_v53, %v518_v54  ;;  %v520_v58 = vsel %vm2865_vm0, %v518_v54, %v516_v53  ;;  %vm2869_vm7 = vmmov %vm2868_vm8 }
 0x55b   : > { %v521_v59 = vsel %vm1722_vm5, %v513_v55, %v520_v58  ;;  %v522_v60 = vsel %vm2861_vm12, %v514_v56, %v519_v57  ;;  %vm531_vm0 = vmxor %vm529_vm15, %vm2775_vm10  ;;  %vm2026_vm15 = vcmp.eq.s32.totalorder %v553_v30, 0 }
 0x55c   : > { %v523_v61 = vmin.f32 %v503_v49, %v521_v59  ;;  %v524_v62 = vmin.f32 %v504_v50, %v522_v60  ;;  %v525_v63 = vmax.f32 %v503_v49, %v521_v59  ;;  %v526_v0 = vmax.f32 %v504_v50, %v522_v60 }
 0x55d   : > { %v2871_v32 = vsel %vm2026_vm15, 4294967295, %v2870_v32 }
 0x55e   : > { %v527_v1 = vsel %vm507_vm9, %v523_v61, %v525_v63  ;;  %v528_v2 = vsel %vm508_vm14, %v524_v62, %v526_v0  ;;  %vm530_vm14 = vmxor %vm1710_vm2, %vm1914_vm3 }
 0x55f   : > { %533 = vrot.lane.b32.xlu0 %v527_v1, %s1542_s21  ;;  %535 = vrot.lane.b32.xlu1 %v528_v2, %s1542_s21  ;;  %vm532_vm9 = vmxor %vm530_vm14, %vm2775_vm10  ;;  %vm2030_vm14 = vcmp.eq.s32.totalorder %v554_v31, 0 }
 0x560   : > { %v2873_v35 = vsel %vm2030_vm14, 4294967295, %v2872_v35 }
 0x563   : > { %539 = vrot.lane.b32.xlu0 %v527_v1, %s1541_s17  ;;  %541 = vrot.lane.b32.xlu1 %v528_v2, %s1541_s17 }
 0x5d1   : > { %v534_v3 = vpop.permute.xlu0 %533  ;;  %v536_v4 = vpop.permute.xlu1 %535 }
 0x5d2   : > { %v537_v11 = vsel %vm2866_vm11, %v534_v3, %v536_v4  ;;  %v538_v14 = vsel %vm2867_vm1, %v536_v4, %v534_v3  ;;  %vm2774_vm11 = vcmp.lt.s32.totalorder %v1698_v7, 112  ;;  %vm2773_vm1 = vcmp.lt.s32.totalorder %v1698_v7, 16 }
 0x5d5   : > { %v540_v5 = vpop.permute.xlu0 %539  ;;  %v542_v8 = vpop.permute.xlu1 %541 }
 0x5d6   : > { %v543_v18 = vsel %vm2868_vm8, %v540_v5, %v542_v8  ;;  %v544_v21 = vsel %vm2869_vm7, %v542_v8, %v540_v5  ;;  %vm557_vm8 = vmxor %vm1910_vm6, %vm2026_vm15 }
 0x5d7   : > { %v545_v22 = vsel %vm1718_vm4, %v537_v11, %v544_v21  ;;  %v546_v23 = vsel %vm1710_vm2, %v538_v14, %v543_v18  ;;  %vm558_vm7 = vmxor %vm1914_vm3, %vm2030_vm14 }
 0x5d8   : > { %v547_v24 = vmin.f32 %v527_v1, %v545_v22  ;;  %v548_v25 = vmin.f32 %v528_v2, %v546_v23  ;;  %v549_v26 = vmax.f32 %v527_v1, %v545_v22  ;;  %v550_v27 = vmax.f32 %v528_v2, %v546_v23 }
 0x5da   : > { %v551_v28 = vsel %vm531_vm0, %v547_v24, %v549_v26  ;;  %v552_v29 = vsel %vm532_vm9, %v548_v25, %v550_v27  ;;  %vm559_vm0 = vmxor %vm557_vm8, %vm2775_vm10  ;;  %vm2874_vm8 = vnez %v2844_v12 }
 0x5db   : > { %561 = vrot.lane.b32.xlu0 %v551_v28, %s1550_s24  ;;  %563 = vrot.lane.b32.xlu1 %v552_v29, %s1550_s24  ;;  %vm560_vm9 = vmxor %vm558_vm7, %vm2775_vm10  ;;  %vm2878_vm10 = vcmp.lt.s32.totalorder %v1698_v7, 8 }
 0x5dc   : > { %vm583_vm7 = vmxor %vm2874_vm8, %vm2026_vm15 }
 0x5df   : > { %568 = vrot.lane.b32.xlu0 %v551_v28, %s1551_s18  ;;  %570 = vrot.lane.b32.xlu1 %v552_v29, %s1551_s18 }
 0x64d   : > { %v562_v33 = vpop.permute.xlu0 %561  ;;  %v564_v34 = vpop.permute.xlu1 %563 }
 0x64e   : > { %v566_v39 = vsel %vm2774_vm11, %v562_v33, %v564_v34  ;;  %v567_v41 = vsel %vm2774_vm11, %v564_v34, %v562_v33 }
 0x651   : > { %v569_v36 = vpop.permute.xlu0 %568  ;;  %v571_v38 = vpop.permute.xlu1 %570 }
 0x652   : > { %v573_v42 = vsel %vm2773_vm1, %v569_v36, %v571_v38  ;;  %v574_v43 = vsel %vm2773_vm1, %v571_v38, %v569_v36  ;;  %vm2876_vm1 = vcmp.lt.s32.totalorder %v1698_v7, 120 }
 0x653   : > { %v575_v44 = vsel %vm1910_vm6, %v566_v39, %v574_v43  ;;  %v576_v45 = vsel %vm1914_vm3, %v567_v41, %v573_v42  ;;  %vm2877_vm11 = vmmov %vm2876_vm1  ;;  %vm2880_vm6 = vmmov 1  }
 0x654   : > { %v577_v46 = vmin.f32 %v551_v28, %v575_v44  ;;  %v578_v47 = vmin.f32 %v552_v29, %v576_v45  ;;  %v579_v48 = vmax.f32 %v551_v28, %v575_v44  ;;  %v580_v49 = vmax.f32 %v552_v29, %v576_v45  ;;  %vm2879_vm3 = vmmov %vm2878_vm10 }
 0x655   : > { %vm585_vm2 = vmxor %vm583_vm7, %vm2880_vm6 }
 0x656   : > { %v581_v50 = vsel %vm559_vm0, %v577_v46, %v579_v48  ;;  %v582_v51 = vsel %vm560_vm9, %v578_v47, %v580_v49  ;;  %vm2875_vm0 = vnez %v2846_v17 }
 0x657   : > { %587 = vrot.lane.b32.xlu0 %v581_v50, %s1548_s22  ;;  %589 = vrot.lane.b32.xlu1 %v582_v51, %s1548_s22  ;;  %vm584_vm9 = vmxor %vm2875_vm0, %vm2030_vm14 }
 0x658   : > { %vm586_vm4 = vmxor %vm584_vm9, %vm2880_vm6 }
 0x65b   : > { %593 = vrot.lane.b32.xlu0 %v581_v50, %s1549_s23  ;;  %595 = vrot.lane.b32.xlu1 %v582_v51, %s1549_s23 }
 0x6c9   : > { %v588_v52 = vpop.permute.xlu0 %587  ;;  %v590_v53 = vpop.permute.xlu1 %589 }
 0x6ca   : > { %v591_v56 = vsel %vm2876_vm1, %v588_v52, %v590_v53  ;;  %v592_v57 = vsel %vm2877_vm11, %v590_v53, %v588_v52  ;;  %vm2884_vm1 = vcmp.lt.s32.totalorder %v1698_v7, 4 }
 0x6cb   : > { %vm2885_vm7 = vmmov %vm2884_vm1 }
 0x6cd   : > { %v594_v54 = vpop.permute.xlu0 %593  ;;  %v596_v55 = vpop.permute.xlu1 %595 }
 0x6ce   : > { %v597_v58 = vsel %vm2878_vm10, %v594_v54, %v596_v55  ;;  %v598_v59 = vsel %vm2879_vm3, %v596_v55, %v594_v54  ;;  %vm607_vm10 = vmxor %vm1756_vm13, %vm2026_vm15  ;;  %vm2882_vm3 = vcmp.lt.s32.totalorder %v1698_v7, 124 }
 0x6cf   : > { %v599_v60 = vsel %vm2874_vm8, %v591_v56, %v598_v59  ;;  %v600_v61 = vsel %vm2875_vm0, %v592_v57, %v597_v58  ;;  %vm2883_vm11 = vmmov %vm2882_vm3 }
 0x6d0   : > { %v601_v62 = vmin.f32 %v581_v50, %v599_v60  ;;  %v602_v63 = vmin.f32 %v582_v51, %v600_v61  ;;  %v603_v0 = vmax.f32 %v581_v50, %v599_v60  ;;  %v604_v1 = vmax.f32 %v582_v51, %v600_v61  ;;  %vm609_vm9 = vmxor %vm607_vm10, %vm2880_vm6 }
 0x6d1   : > { %vm631_vm10 = vmxor %vm1722_vm5, %vm2026_vm15 }
 0x6d2   : > { %v605_v2 = vsel %vm585_vm2, %v601_v62, %v603_v0  ;;  %v606_v3 = vsel %vm586_vm4, %v602_v63, %v604_v1  ;;  %vm2881_vm2 = vnez %v2842_v40 }
 0x6d3   : > { %611 = vrot.lane.b32.xlu0 %v605_v2, %s1546_s15  ;;  %613 = vrot.lane.b32.xlu1 %v606_v3, %s1546_s15  ;;  %vm608_vm4 = vmxor %vm2881_vm2, %vm2030_vm14 }
 0x6d4   : > { %vm610_vm0 = vmxor %vm608_vm4, %vm2880_vm6  ;;  %vm2886_vm4 = vcmp.lt.s32.totalorder %v1698_v7, 126 }
 0x6d7   : > { %617 = vrot.lane.b32.xlu0 %v605_v2, %s1547_s16  ;;  %619 = vrot.lane.b32.xlu1 %v606_v3, %s1547_s16 }
 0x745   : > { %v612_v4 = vpop.permute.xlu0 %611  ;;  %v614_v5 = vpop.permute.xlu1 %613 }
 0x746   : > { %v615_v14 = vsel %vm2882_vm3, %v612_v4, %v614_v5  ;;  %v616_v18 = vsel %vm2883_vm11, %v614_v5, %v612_v4  ;;  %vm2887_vm3 = vmmov %vm2886_vm4  ;;  %vm2888_vm11 = vcmp.lt.s32.totalorder %v1698_v7, 2  ;;  %v680_v4 = vand.u32 64, %v1701_v9 }
 0x749   : > { %v618_v8 = vpop.permute.xlu0 %617  ;;  %v620_v11 = vpop.permute.xlu1 %619 }
 0x74a   : > { %v621_v21 = vsel %vm2884_vm1, %v618_v8, %v620_v11  ;;  %v622_v22 = vsel %vm2885_vm7, %v620_v11, %v618_v8  ;;  %vm2889_vm1 = vmmov %vm2888_vm11 }
 0x74b   : > { %v623_v23 = vsel %vm1756_vm13, %v615_v14, %v622_v22  ;;  %v624_v24 = vsel %vm2881_vm2, %v616_v18, %v621_v21  ;;  %vm633_vm7 = vmxor %vm631_vm10, %vm2880_vm6  ;;  %vm2890_vm10 = vnez %v2836_v19 }
 0x74c   : > { %v625_v25 = vmin.f32 %v605_v2, %v623_v23  ;;  %v626_v26 = vmin.f32 %v606_v3, %v624_v24  ;;  %v627_v27 = vmax.f32 %v605_v2, %v623_v23  ;;  %v628_v28 = vmax.f32 %v606_v3, %v624_v24 }
 0x74d   : > { %v679_v3 = vand.u32 64, %v1704_v10 }
 0x74e   : > { %v629_v29 = vsel %vm609_vm9, %v625_v25, %v627_v27  ;;  %v630_v30 = vsel %vm610_vm0, %v626_v26, %v628_v28  ;;  %vm632_vm0 = vmxor %vm2861_vm12, %vm2030_vm14 }
 0x74f   : > { %635 = vrot.lane.b32.xlu0 %v629_v29, %s1544_s19  ;;  %637 = vrot.lane.b32.xlu1 %v630_v30, %s1544_s19  ;;  %vm634_vm9 = vmxor %vm632_vm0, %vm2880_vm6 }
 0x750   : > { %vm655_vm0 = vmxor %vm2890_vm10, %vm2026_vm15 }
 0x753   : > { %641 = vrot.lane.b32.xlu0 %v629_v29, %s1545_s8  ;;  %643 = vrot.lane.b32.xlu1 %v630_v30, %s1545_s8 }
 0x7c1   : > { %v636_v31 = vpop.permute.xlu0 %635  ;;  %v638_v33 = vpop.permute.xlu1 %637 }
 0x7c2   : > { %v639_v38 = vsel %vm2886_vm4, %v636_v31, %v638_v33  ;;  %v640_v39 = vsel %vm2887_vm3, %v638_v33, %v636_v31  ;;  %vm2891_vm4 = vnez %v2832_v15 }
 0x7c3   : > { %vm656_vm3 = vmxor %vm2891_vm4, %vm2030_vm14 }
 0x7c5   : > { %v642_v34 = vpop.permute.xlu0 %641  ;;  %v644_v36 = vpop.permute.xlu1 %643 }
 0x7c6   : > { %v645_v41 = vsel %vm2888_vm11, %v642_v34, %v644_v36  ;;  %v646_v42 = vsel %vm2889_vm1, %v644_v36, %v642_v34  ;;  %vm2892_vm11 = vcmp.lt.s32.totalorder %v1698_v7, 127 }
 0x7c7   : > { %v647_v43 = vsel %vm1722_vm5, %v639_v38, %v646_v42  ;;  %v648_v44 = vsel %vm2861_vm12, %v640_v39, %v645_v41  ;;  %vm2893_vm1 = vmmov %vm2892_vm11 }
 0x7c8   : > { %v649_v45 = vmin.f32 %v629_v29, %v647_v43  ;;  %v650_v46 = vmin.f32 %v630_v30, %v648_v44  ;;  %v651_v47 = vmax.f32 %v629_v29, %v647_v43  ;;  %v652_v48 = vmax.f32 %v630_v30, %v648_v44  ;;  %vm657_vm12 = vmxor %vm655_vm0, %vm2880_vm6 }
 0x7c9   : > { %vm658_vm5 = vmxor %vm656_vm3, %vm2880_vm6  ;;  %vm2168_vm0 = vcmp.eq.s32.totalorder %v679_v3, 0  ;;  %vm2789_vm3 = vcmp.lt.s32.totalorder %v1698_v7, 32 }
 0x7ca   : > { %v653_v49 = vsel %vm633_vm7, %v649_v45, %v651_v47  ;;  %v654_v50 = vsel %vm634_vm9, %v650_v46, %v652_v48  ;;  %vm2894_vm7 = vcmp.lt.s32.totalorder %v1698_v7, 1 }
 0x7cb   : > { %659 = vrot.lane.b32.xlu0 %v653_v49, %s1542_s21  ;;  %661 = vrot.lane.b32.xlu1 %v654_v50, %s1542_s21  ;;  %vm2895_vm9 = vmmov %vm2894_vm7 }
 0x7cf   : > { %665 = vrot.lane.b32.xlu0 %v653_v49, %s1541_s17  ;;  %667 = vrot.lane.b32.xlu1 %v654_v50, %s1541_s17 }
 0x83d   : > { %v660_v51 = vpop.permute.xlu0 %659  ;;  %v662_v52 = vpop.permute.xlu1 %661 }
 0x83e   : > { %v663_v55 = vsel %vm2892_vm11, %v660_v51, %v662_v52  ;;  %v664_v56 = vsel %vm2893_vm1, %v662_v52, %v660_v51  ;;  %vm683_vm11 = vmxor %vm2026_vm15, %vm2168_vm0 }
 0x841   : > { %v666_v53 = vpop.permute.xlu0 %665  ;;  %v668_v54 = vpop.permute.xlu1 %667 }
 0x842   : > { %v669_v57 = vsel %vm2894_vm7, %v666_v53, %v668_v54  ;;  %v670_v58 = vsel %vm2895_vm9, %v668_v54, %v666_v53  ;;  %vm685_vm7 = vmxor %vm683_vm11, %vm2880_vm6  ;;  %vm2900_vm11 = vnez %v2854_v6 }
 0x843   : > { %v671_v59 = vsel %vm2890_vm10, %v663_v55, %v670_v58  ;;  %v672_v60 = vsel %vm2891_vm4, %v664_v56, %v669_v57 }
 0x844   : > { %v673_v61 = vmin.f32 %v653_v49, %v671_v59  ;;  %v674_v62 = vmin.f32 %v654_v50, %v672_v60  ;;  %v675_v63 = vmax.f32 %v653_v49, %v671_v59  ;;  %v676_v0 = vmax.f32 %v654_v50, %v672_v60 }
 0x846   : > { %v677_v1 = vsel %vm657_vm12, %v673_v61, %v675_v63  ;;  %v678_v2 = vsel %vm658_vm5, %v674_v62, %v676_v0  ;;  %vm2172_vm5 = vcmp.eq.s32.totalorder %v680_v4, 0  ;;  %vm2790_vm12 = vcmp.lt.s32.totalorder %v1698_v7, 96 }
 0x847   : > { %687 = vrot.lane.b32.xlu0 %v677_v1, %s1552_s27  ;;  %689 = vrot.lane.b32.xlu1 %v678_v2, %s1552_s27  ;;  %vm684_vm1 = vmxor %vm2030_vm14, %vm2172_vm5 }
 0x848   : > { %vm686_vm9 = vmxor %vm684_vm1, %vm2880_vm6 }
 0x849   : > { %vm709_vm1 = vmxor %vm2900_vm11, %vm2168_vm0 }
 0x84a   : > { %vm711_vm4 = vmxor %vm709_vm1, %vm2880_vm6 }
 0x84b   : > { %694 = vrot.lane.b32.xlu0 %v677_v1, %s1553_s26  ;;  %696 = vrot.lane.b32.xlu1 %v678_v2, %s1553_s26 }
 0x8b9   : > { %v688_v8 = vpop.permute.xlu0 %687  ;;  %v690_v11 = vpop.permute.xlu1 %689 }
 0x8ba   : > { %v692_v18 = vsel %vm2790_vm12, %v688_v8, %v690_v11  ;;  %v693_v21 = vsel %vm2790_vm12, %v690_v11, %v688_v8 }
 0x8bd   : > { %v695_v9 = vpop.permute.xlu0 %694  ;;  %v697_v10 = vpop.permute.xlu1 %696 }
 0x8be   : > { %v699_v22 = vsel %vm2789_vm3, %v695_v9, %v697_v10  ;;  %v700_v23 = vsel %vm2789_vm3, %v697_v10, %v695_v9  ;;  %vm2902_vm3 = vcmp.lt.s32.totalorder %v1698_v7, 112 }
 0x8bf   : > { %v701_v24 = vsel %vm2026_vm15, %v692_v18, %v700_v23  ;;  %v702_v25 = vsel %vm2030_vm14, %v693_v21, %v699_v22  ;;  %vm2903_vm12 = vmmov %vm2902_vm3  ;;  %vm2904_vm14 = vcmp.lt.s32.totalorder %v1698_v7, 16 }
 0x8c0   : > { %v703_v26 = vmin.f32 %v677_v1, %v701_v24  ;;  %v704_v27 = vmin.f32 %v678_v2, %v702_v25  ;;  %v705_v28 = vmax.f32 %v677_v1, %v701_v24  ;;  %v706_v29 = vmax.f32 %v678_v2, %v702_v25  ;;  %vm2905_vm15 = vmmov %vm2904_vm14 }
 0x8c2   : > { %v707_v30 = vsel %vm685_vm7, %v703_v26, %v705_v28  ;;  %v708_v31 = vsel %vm686_vm9, %v704_v27, %v706_v29  ;;  %vm2901_vm7 = vnez %v2856_v13 }
 0x8c3   : > { %713 = vrot.lane.b32.xlu0 %v707_v30, %s1550_s24  ;;  %715 = vrot.lane.b32.xlu1 %v708_v31, %s1550_s24  ;;  %vm710_vm9 = vmxor %vm2901_vm7, %vm2172_vm5 }
 0x8c4   : > { %vm712_vm10 = vmxor %vm710_vm9, %vm2880_vm6 }
 0x8c7   : > { %719 = vrot.lane.b32.xlu0 %v707_v30, %s1551_s18  ;;  %721 = vrot.lane.b32.xlu1 %v708_v31, %s1551_s18 }
 0x935   : > { %v714_v33 = vpop.permute.xlu0 %713  ;;  %v716_v34 = vpop.permute.xlu1 %715 }
 0x936   : > { %v717_v39 = vsel %vm2902_vm3, %v714_v33, %v716_v34  ;;  %v718_v41 = vsel %vm2903_vm12, %v716_v34, %v714_v33  ;;  %vm2909_vm3 = vcmp.lt.s32.totalorder %v1698_v7, 8 }
 0x937   : > { %vm2910_vm1 = vmmov %vm2909_vm3 }
 0x939   : > { %v720_v36 = vpop.permute.xlu0 %719  ;;  %v722_v38 = vpop.permute.xlu1 %721 }
 0x93a   : > { %v723_v42 = vsel %vm2904_vm14, %v720_v36, %v722_v38  ;;  %v724_v43 = vsel %vm2905_vm15, %v722_v38, %v720_v36  ;;  %vm733_vm15 = vmxor %vm2874_vm8, %vm2168_vm0  ;;  %vm2906_vm14 = vnez %v2846_v17 }
 0x93b   : > { %v725_v44 = vsel %vm2900_vm11, %v717_v39, %v724_v43  ;;  %v726_v45 = vsel %vm2901_vm7, %v718_v41, %v723_v42  ;;  %vm735_vm9 = vmxor %vm733_vm15, %vm2880_vm6 }
 0x93c   : > { %v727_v46 = vmin.f32 %v707_v30, %v725_v44  ;;  %v728_v47 = vmin.f32 %v708_v31, %v726_v45  ;;  %v729_v48 = vmax.f32 %v707_v30, %v725_v44  ;;  %v730_v49 = vmax.f32 %v708_v31, %v726_v45  ;;  %vm757_vm15 = vmxor %vm1756_vm13, %vm2168_vm0 }
 0x93e   : > { %v731_v50 = vsel %vm711_vm4, %v727_v46, %v729_v48  ;;  %v732_v51 = vsel %vm712_vm10, %v728_v47, %v730_v49  ;;  %vm734_vm10 = vmxor %vm2906_vm14, %vm2172_vm5  ;;  %vm2907_vm4 = vcmp.lt.s32.totalorder %v1698_v7, 120 }
 0x93f   : > { %737 = vrot.lane.b32.xlu0 %v731_v50, %s1548_s22  ;;  %739 = vrot.lane.b32.xlu1 %v732_v51, %s1548_s22  ;;  %vm2908_vm12 = vmmov %vm2907_vm4 }
 0x940   : > { %vm736_vm7 = vmxor %vm734_vm10, %vm2880_vm6  ;;  %vm2911_vm10 = vcmp.lt.s32.totalorder %v1698_v7, 124 }
 0x943   : > { %743 = vrot.lane.b32.xlu0 %v731_v50, %s1549_s23  ;;  %745 = vrot.lane.b32.xlu1 %v732_v51, %s1549_s23 }
 0x9b1   : > { %v738_v52 = vpop.permute.xlu0 %737  ;;  %v740_v53 = vpop.permute.xlu1 %739 }
 0x9b2   : > { %v741_v56 = vsel %vm2907_vm4, %v738_v52, %v740_v53  ;;  %v742_v57 = vsel %vm2908_vm12, %v740_v53, %v738_v52  ;;  %vm2912_vm4 = vmmov %vm2911_vm10  ;;  %vm2913_vm12 = vcmp.lt.s32.totalorder %v1698_v7, 4 }
 0x9b5   : > { %v744_v54 = vpop.permute.xlu0 %743  ;;  %v746_v55 = vpop.permute.xlu1 %745 }
 0x9b6   : > { %v747_v58 = vsel %vm2909_vm3, %v744_v54, %v746_v55  ;;  %v748_v59 = vsel %vm2910_vm1, %v746_v55, %v744_v54  ;;  %vm2914_vm3 = vmmov %vm2913_vm12 }
 0x9b7   : > { %v749_v60 = vsel %vm2874_vm8, %v741_v56, %v748_v59  ;;  %v750_v61 = vsel %vm2906_vm14, %v742_v57, %v747_v58  ;;  %vm759_vm1 = vmxor %vm757_vm15, %vm2880_vm6  ;;  %vm2915_vm15 = vnez %v2838_v20 }
 0x9b8   : > { %v751_v62 = vmin.f32 %v731_v50, %v749_v60  ;;  %v752_v63 = vmin.f32 %v732_v51, %v750_v61  ;;  %v753_v0 = vmax.f32 %v731_v50, %v749_v60  ;;  %v754_v1 = vmax.f32 %v732_v51, %v750_v61 }
 0x9ba   : > { %v755_v2 = vsel %vm735_vm9, %v751_v62, %v753_v0  ;;  %v756_v3 = vsel %vm736_vm7, %v752_v63, %v754_v1  ;;  %vm758_vm7 = vmxor %vm2881_vm2, %vm2172_vm5 }
 0x9bb   : > { %761 = vrot.lane.b32.xlu0 %v755_v2, %s1546_s15  ;;  %763 = vrot.lane.b32.xlu1 %v756_v3, %s1546_s15  ;;  %vm760_vm9 = vmxor %vm758_vm7, %vm2880_vm6 }
 0x9bc   : > { %vm781_vm7 = vmxor %vm2915_vm15, %vm2168_vm0 }
 0x9bf   : > { %767 = vrot.lane.b32.xlu0 %v755_v2, %s1547_s16  ;;  %769 = vrot.lane.b32.xlu1 %v756_v3, %s1547_s16 }
 0xa2d   : > { %v762_v4 = vpop.permute.xlu0 %761  ;;  %v764_v8 = vpop.permute.xlu1 %763 }
 0xa2e   : > { %v765_v10 = vsel %vm2911_vm10, %v762_v4, %v764_v8  ;;  %v766_v18 = vsel %vm2912_vm4, %v764_v8, %v762_v4  ;;  %vm2916_vm10 = vnez %v2834_v16 }
 0xa2f   : > { %vm782_vm4 = vmxor %vm2916_vm10, %vm2172_vm5 }
 0xa31   : > { %v768_v11 = vpop.permute.xlu0 %767  ;;  %v770_v9 = vpop.permute.xlu1 %769 }
 0xa32   : > { %v771_v21 = vsel %vm2913_vm12, %v768_v11, %v770_v9  ;;  %v772_v22 = vsel %vm2914_vm3, %v770_v9, %v768_v11  ;;  %vm2917_vm12 = vcmp.lt.s32.totalorder %v1698_v7, 126  ;;  %v2927_v9 = vmov 0 }
 0xa33   : > { %v773_v23 = vsel %vm1756_vm13, %v765_v10, %v772_v22  ;;  %v774_v24 = vsel %vm2881_vm2, %v766_v18, %v771_v21  ;;  %vm2918_vm3 = vmmov %vm2917_vm12  ;;  %v2929_v21 = vmov 0 }
 0xa34   : > { %v775_v25 = vmin.f32 %v755_v2, %v773_v23  ;;  %v776_v26 = vmin.f32 %v756_v3, %v774_v24  ;;  %v777_v27 = vmax.f32 %v755_v2, %v773_v23  ;;  %v778_v28 = vmax.f32 %v756_v3, %v774_v24  ;;  %vm783_vm2 = vmxor %vm781_vm7, %vm2880_vm6 }
 0xa35   : > { %vm784_vm13 = vmxor %vm782_vm4, %vm2880_vm6  ;;  %vm2921_vm7 = vnez %v2836_v19 }
 0xa36   : > { %v779_v29 = vsel %vm759_vm1, %v775_v25, %v777_v27  ;;  %v780_v30 = vsel %vm760_vm9, %v776_v26, %v778_v28  ;;  %vm2919_vm1 = vcmp.lt.s32.totalorder %v1698_v7, 2  ;;  %vm805_vm4 = vmxor %vm2921_vm7, %vm2168_vm0 }
 0xa37   : > { %785 = vrot.lane.b32.xlu0 %v779_v29, %s1544_s19  ;;  %787 = vrot.lane.b32.xlu1 %v780_v30, %s1544_s19  ;;  %vm2920_vm9 = vmmov %vm2919_vm1 }
 0xa3b   : > { %791 = vrot.lane.b32.xlu0 %v779_v29, %s1545_s8  ;;  %793 = vrot.lane.b32.xlu1 %v780_v30, %s1545_s8 }
 0xaa9   : > { %v786_v31 = vpop.permute.xlu0 %785  ;;  %v788_v33 = vpop.permute.xlu1 %787 }
 0xaaa   : > { %v789_v38 = vsel %vm2917_vm12, %v786_v31, %v788_v33  ;;  %v790_v39 = vsel %vm2918_vm3, %v788_v33, %v786_v31  ;;  %vm2923_vm12 = vcmp.lt.s32.totalorder %v1698_v7, 127 }
 0xaab   : > { %vm2924_vm3 = vmmov %vm2923_vm12 }
 0xaad   : > { %v792_v34 = vpop.permute.xlu0 %791  ;;  %v794_v36 = vpop.permute.xlu1 %793 }
 0xaae   : > { %v795_v41 = vsel %vm2919_vm1, %v792_v34, %v794_v36  ;;  %v796_v42 = vsel %vm2920_vm9, %v794_v36, %v792_v34  ;;  %vm2925_vm1 = vcmp.lt.s32.totalorder %v1698_v7, 1 }
 0xaaf   : > { %v797_v43 = vsel %vm2915_vm15, %v789_v38, %v796_v42  ;;  %v798_v44 = vsel %vm2916_vm10, %v790_v39, %v795_v41  ;;  %vm2926_vm9 = vmmov %vm2925_vm1  ;;  %v2936_v39 = vmov 0 }
 0xab0   : > { %v799_v45 = vmin.f32 %v779_v29, %v797_v43  ;;  %v800_v46 = vmin.f32 %v780_v30, %v798_v44  ;;  %v801_v47 = vmax.f32 %v779_v29, %v797_v43  ;;  %v802_v48 = vmax.f32 %v780_v30, %v798_v44  ;;  %vm807_vm10 = vmxor %vm805_vm4, %vm2880_vm6 }
 0xab1   : > { %vm2803_vm4 = vcmp.lt.s32.totalorder %v1698_v7, 64  ;;  %v2939_v43 = vmov 0 }
 0xab2   : > { %v803_v49 = vsel %vm783_vm2, %v799_v45, %v801_v47  ;;  %v804_v50 = vsel %vm784_vm13, %v800_v46, %v802_v48  ;;  %vm2922_vm2 = vnez %v2832_v15 }
 0xab3   : > { %809 = vrot.lane.b32.xlu0 %v803_v49, %s1542_s21  ;;  %811 = vrot.lane.b32.xlu1 %v804_v50, %s1542_s21  ;;  %vm806_vm13 = vmxor %vm2922_vm2, %vm2172_vm5 }
 0xab4   : > { %vm808_vm15 = vmxor %vm806_vm13, %vm2880_vm6  ;;  %vm2931_vm13 = vnez %v2871_v32 }
 0xab7   : > { %815 = vrot.lane.b32.xlu0 %v803_v49, %s1541_s17  ;;  %817 = vrot.lane.b32.xlu1 %v804_v50, %s1541_s17 }
 0xb25   : > { %v810_v51 = vpop.permute.xlu0 %809  ;;  %v812_v52 = vpop.permute.xlu1 %811 }
 0xb26   : > { %v813_v55 = vsel %vm2923_vm12, %v810_v51, %v812_v52  ;;  %v814_v56 = vsel %vm2924_vm3, %v812_v52, %v810_v51  ;;  %vm833_vm12 = vmxor %vm2168_vm0, %vm2880_vm6 }
 0xb27   : > { %vm852_vm3 = vmxor %vm2931_vm13, %vm2880_vm6 }
 0xb29   : > { %v816_v53 = vpop.permute.xlu0 %815  ;;  %v818_v54 = vpop.permute.xlu1 %817 }
 0xb2a   : > { %v819_v57 = vsel %vm2925_vm1, %v816_v53, %v818_v54  ;;  %v820_v58 = vsel %vm2926_vm9, %v818_v54, %v816_v53  ;;  %vm2932_vm1 = vcmp.lt.s32.totalorder %v1698_v7, 96 }
 0xb2b   : > { %v821_v59 = vsel %vm2921_vm7, %v813_v55, %v820_v58  ;;  %v822_v60 = vsel %vm2922_vm2, %v814_v56, %v819_v57  ;;  %vm2933_vm9 = vmmov %vm2932_vm1  ;;  %v2945_v58 = vmov 0 }
 0xb2c   : > { %v823_v61 = vmin.f32 %v803_v49, %v821_v59  ;;  %v824_v62 = vmin.f32 %v804_v50, %v822_v60  ;;  %v825_v63 = vmax.f32 %v803_v49, %v821_v59  ;;  %v826_v0 = vmax.f32 %v804_v50, %v822_v60 }
 0xb2e   : > { %v827_v1 = vsel %vm807_vm10, %v823_v61, %v825_v63  ;;  %v828_v2 = vsel %vm808_vm15, %v824_v62, %v826_v0  ;;  %vm2343_vm15 = vmxor %vm2172_vm5, %vm2880_vm6  ;;  %v2948_v61 = vmov 0 }
 0xb2f   : > { %837 = vrot.lane.b32.xlu0 %v827_v1, %s1554_s28  ;;  %839 = vrot.lane.b32.xlu1 %v828_v2, %s1554_s28  ;;  %v2928_v9 = vsel %vm2343_vm15, 4294967295, %v2927_v9  ;;  %vm2352_vm10 = vmxor %vm833_vm12, %vm2880_vm6  ;;  %vm2934_vm12 = vcmp.lt.s32.totalorder %v1698_v7, 32 }
 0xb30   : > { %v2930_v21 = vsel %vm2352_vm10, 4294967295, %v2929_v21 }
 0xba1   : > { %v838_v3 = vpop.permute.xlu0 %837  ;;  %v840_v4 = vpop.permute.xlu1 %839 }
 0xba2   : > { %v842_v8 = vsel %vm2803_vm4, %v838_v3, %v840_v4  ;;  %v843_v11 = vsel %vm2803_vm4, %v840_v4, %v838_v3  ;;  %vm2935_vm4 = vmmov %vm2934_vm12 }
 0xba3   : > { %v844_v10 = vsel %vm2168_vm0, %v842_v8, %v843_v11  ;;  %v845_v18 = vsel %vm2172_vm5, %v843_v11, %v842_v8 }
 0xba4   : > { %v846_v22 = vmin.f32 %v827_v1, %v844_v10  ;;  %v847_v23 = vmin.f32 %v828_v2, %v845_v18  ;;  %v848_v24 = vmax.f32 %v827_v1, %v844_v10  ;;  %v849_v25 = vmax.f32 %v828_v2, %v845_v18 }
 0xba6   : > { %v851_v26 = vsel %vm2343_vm15, %v847_v23, %v849_v25  ;;  %v850_v27 = vsel %vm2352_vm10, %v846_v22, %v848_v24  ;;  %vm2376_vm10 = vmxor %vm852_vm3, %vm2880_vm6  ;;  %vm2938_vm15 = vnez %v2873_v35  ;;  %vm2941_vm3 = vcmp.lt.s32.totalorder %v1698_v7, 112 }
 0xba7   : > { %858 = vrot.lane.b32.xlu1 %v851_v26, %s1552_s27  ;;  %856 = vrot.lane.b32.xlu0 %v850_v27, %s1552_s27  ;;  %v2937_v39 = vsel %vm2376_vm10, 4294967295, %v2936_v39  ;;  %v2954_v25 = vmov 0 }
 0xbab   : > { %864 = vrot.lane.b32.xlu1 %v851_v26, %s1553_s26  ;;  %862 = vrot.lane.b32.xlu0 %v850_v27, %s1553_s26 }
 0xc19   : > { %v859_v28 = vpop.permute.xlu1 %858  ;;  %v857_v29 = vpop.permute.xlu0 %856 }
 0xc1a   : > { %v860_v33 = vsel %vm2932_vm1, %v857_v29, %v859_v28  ;;  %v861_v34 = vsel %vm2933_vm9, %v859_v28, %v857_v29  ;;  %vm2387_vm1 = vmxor %vm2938_vm15, %vm2880_vm6  ;;  %v2956_v28 = vmov 0 }
 0xc1b   : > { %v2940_v43 = vsel %vm2387_vm1, 4294967295, %v2939_v43  ;;  %vm2942_vm9 = vmmov %vm2941_vm3 }
 0xc1d   : > { %v865_v30 = vpop.permute.xlu1 %864  ;;  %v863_v31 = vpop.permute.xlu0 %862 }
 0xc1e   : > { %v866_v36 = vsel %vm2934_vm12, %v863_v31, %v865_v30  ;;  %v867_v38 = vsel %vm2935_vm4, %v865_v30, %v863_v31  ;;  %vm876_vm4 = vmxor %vm2900_vm11, %vm2880_vm6  ;;  %vm2943_vm12 = vcmp.lt.s32.totalorder %v1698_v7, 16 }
 0xc1f   : > { %v868_v41 = vsel %vm2931_vm13, %v860_v33, %v867_v38  ;;  %v869_v42 = vsel %vm2938_vm15, %v861_v34, %v866_v36  ;;  %vm2947_vm15 = vnez %v2856_v13 }
 0xc20   : > { %v870_v44 = vmin.f32 %v850_v27, %v868_v41  ;;  %v871_v45 = vmin.f32 %v851_v26, %v869_v42  ;;  %v872_v46 = vmax.f32 %v850_v27, %v868_v41  ;;  %v873_v47 = vmax.f32 %v851_v26, %v869_v42 }
 0xc22   : > { %v874_v48 = vsel %vm2376_vm10, %v870_v44, %v872_v46  ;;  %v875_v49 = vsel %vm2387_vm1, %v871_v45, %v873_v47  ;;  %vm2944_vm10 = vmmov %vm2943_vm12 }
 0xc23   : > { %880 = vrot.lane.b32.xlu0 %v874_v48, %s1550_s24  ;;  %882 = vrot.lane.b32.xlu1 %v875_v49, %s1550_s24  ;;  %vm2411_vm1 = vmxor %vm876_vm4, %vm2880_vm6  ;;  %vm2950_vm4 = vcmp.lt.s32.totalorder %v1698_v7, 120 }
 0xc24   : > { %v2946_v58 = vsel %vm2411_vm1, 4294967295, %v2945_v58 }
 0xc27   : > { %886 = vrot.lane.b32.xlu0 %v874_v48, %s1551_s18  ;;  %888 = vrot.lane.b32.xlu1 %v875_v49, %s1551_s18 }
 0xc95   : > { %v881_v50 = vpop.permute.xlu0 %880  ;;  %v883_v51 = vpop.permute.xlu1 %882 }
 0xc96   : > { %v884_v54 = vsel %vm2941_vm3, %v881_v50, %v883_v51  ;;  %v885_v55 = vsel %vm2942_vm9, %v883_v51, %v881_v50  ;;  %vm2422_vm3 = vmxor %vm2947_vm15, %vm2880_vm6 }
 0xc97   : > { %v2949_v61 = vsel %vm2422_vm3, 4294967295, %v2948_v61  ;;  %vm2951_vm9 = vmmov %vm2950_vm4 }
 0xc99   : > { %v887_v52 = vpop.permute.xlu0 %886  ;;  %v889_v53 = vpop.permute.xlu1 %888 }
 0xc9a   : > { %v890_v56 = vsel %vm2943_vm12, %v887_v52, %v889_v53  ;;  %v891_v57 = vsel %vm2944_vm10, %v889_v53, %v887_v52  ;;  %vm900_vm10 = vmxor %vm2874_vm8, %vm2880_vm6  ;;  %vm2952_vm12 = vcmp.lt.s32.totalorder %v1698_v7, 8  ;;  %v2966_v52 = vmov 0 }
 0xc9b   : > { %v892_v59 = vsel %vm2900_vm11, %v884_v54, %v891_v57  ;;  %v893_v60 = vsel %vm2947_vm15, %v885_v55, %v890_v56 }
 0xc9c   : > { %v894_v62 = vmin.f32 %v874_v48, %v892_v59  ;;  %v895_v63 = vmin.f32 %v875_v49, %v893_v60  ;;  %v896_v0 = vmax.f32 %v874_v48, %v892_v59  ;;  %v897_v1 = vmax.f32 %v875_v49, %v893_v60 }
 0xc9d   : > { %v2963_v49 = vmov 0 }
 0xc9e   : > { %v898_v2 = vsel %vm2411_vm1, %v894_v62, %v896_v0  ;;  %v899_v3 = vsel %vm2422_vm3, %v895_v63, %v897_v1  ;;  %vm2953_vm1 = vmmov %vm2952_vm12 }
 0xc9f   : > { %904 = vrot.lane.b32.xlu0 %v898_v2, %s1548_s22  ;;  %906 = vrot.lane.b32.xlu1 %v899_v3, %s1548_s22  ;;  %vm2446_vm3 = vmxor %vm900_vm10, %vm2880_vm6 }
 0xca0   : > { %v2955_v25 = vsel %vm2446_vm3, 4294967295, %v2954_v25 }
 0xca3   : > { %910 = vrot.lane.b32.xlu0 %v898_v2, %s1549_s23  ;;  %912 = vrot.lane.b32.xlu1 %v899_v3, %s1549_s23 }
 0xd11   : > { %v905_v4 = vpop.permute.xlu0 %904  ;;  %v907_v8 = vpop.permute.xlu1 %906 }
 0xd12   : > { %v908_v18 = vsel %vm2950_vm4, %v905_v4, %v907_v8  ;;  %v909_v22 = vsel %vm2951_vm9, %v907_v8, %v905_v4  ;;  %vm2457_vm4 = vmxor %vm2906_vm14, %vm2880_vm6  ;;  %vm2959_vm9 = vcmp.lt.s32.totalorder %v1698_v7, 124  ;;  %v2973_v8 = vmov 0 }
 0xd13   : > { %v2957_v28 = vsel %vm2457_vm4, 4294967295, %v2956_v28 }
 0xd15   : > { %v911_v11 = vpop.permute.xlu0 %910  ;;  %v913_v10 = vpop.permute.xlu1 %912 }
 0xd16   : > { %v914_v23 = vsel %vm2952_vm12, %v911_v11, %v913_v10  ;;  %v915_v24 = vsel %vm2953_vm1, %v913_v10, %v911_v11  ;;  %vm2958_vm1 = vnez %v2840_v37  ;;  %vm2960_vm12 = vmmov %vm2959_vm9 }
 0xd17   : > { %v916_v26 = vsel %vm2874_vm8, %v908_v18, %v915_v24  ;;  %v917_v27 = vsel %vm2906_vm14, %v909_v22, %v914_v23  ;;  %vm924_vm10 = vmxor %vm2958_vm1, %vm2880_vm6  ;;  %vm2965_vm8 = vnez %v2842_v40  ;;  %v2976_v18 = vmov 0 }
 0xd18   : > { %v918_v29 = vmin.f32 %v898_v2, %v916_v26  ;;  %v919_v30 = vmin.f32 %v899_v3, %v917_v27  ;;  %v920_v31 = vmax.f32 %v898_v2, %v916_v26  ;;  %v921_v33 = vmax.f32 %v899_v3, %v917_v27  ;;  %vm2481_vm14 = vmxor %vm924_vm10, %vm2880_vm6 }
 0xd19   : > { %v2964_v49 = vsel %vm2481_vm14, 4294967295, %v2963_v49  ;;  %vm2969_vm10 = vcmp.lt.s32.totalorder %v1698_v7, 126 }
 0xd1a   : > { %v922_v34 = vsel %vm2446_vm3, %v918_v29, %v920_v31  ;;  %v923_v36 = vsel %vm2457_vm4, %v919_v30, %v921_v33  ;;  %vm2961_vm3 = vcmp.lt.s32.totalorder %v1698_v7, 4 }
 0xd1b   : > { %928 = vrot.lane.b32.xlu0 %v922_v34, %s1546_s15  ;;  %930 = vrot.lane.b32.xlu1 %v923_v36, %s1546_s15  ;;  %vm2962_vm4 = vmmov %vm2961_vm3 }
 0xd1f   : > { %934 = vrot.lane.b32.xlu0 %v922_v34, %s1547_s16  ;;  %936 = vrot.lane.b32.xlu1 %v923_v36, %s1547_s16 }
 0xd8d   : > { %v929_v38 = vpop.permute.xlu0 %928  ;;  %v931_v41 = vpop.permute.xlu1 %930 }
 0xd8e   : > { %v932_v45 = vsel %vm2959_vm9, %v929_v38, %v931_v41  ;;  %v933_v46 = vsel %vm2960_vm12, %v931_v41, %v929_v38  ;;  %vm2492_vm9 = vmxor %vm2965_vm8, %vm2880_vm6 }
 0xd8f   : > { %v2967_v52 = vsel %vm2492_vm9, 4294967295, %v2966_v52  ;;  %vm2970_vm12 = vmmov %vm2969_vm10 }
 0xd91   : > { %v935_v42 = vpop.permute.xlu0 %934  ;;  %v937_v44 = vpop.permute.xlu1 %936 }
 0xd92   : > { %v938_v47 = vsel %vm2961_vm3, %v935_v42, %v937_v44  ;;  %v939_v48 = vsel %vm2962_vm4, %v937_v44, %v935_v42  ;;  %vm2968_vm3 = vnez %v2838_v20  ;;  %v2982_v44 = vmov 0 }
 0xd93   : > { %v940_v50 = vsel %vm2958_vm1, %v932_v45, %v939_v48  ;;  %v941_v51 = vsel %vm2965_vm8, %v933_v46, %v938_v47  ;;  %vm948_vm4 = vmxor %vm2968_vm3, %vm2880_vm6  ;;  %vm2975_vm1 = vnez %v2834_v16 }
 0xd94   : > { %v942_v53 = vmin.f32 %v922_v34, %v940_v50  ;;  %v943_v54 = vmin.f32 %v923_v36, %v941_v51  ;;  %v944_v55 = vmax.f32 %v922_v34, %v940_v50  ;;  %v945_v56 = vmax.f32 %v923_v36, %v941_v51  ;;  %vm2516_vm8 = vmxor %vm948_vm4, %vm2880_vm6 }
 0xd95   : > { %v2974_v8 = vsel %vm2516_vm8, 4294967295, %v2973_v8 }
 0xd96   : > { %v946_v57 = vsel %vm2481_vm14, %v942_v53, %v944_v55  ;;  %v947_v59 = vsel %vm2492_vm9, %v943_v54, %v945_v56  ;;  %vm2971_vm14 = vcmp.lt.s32.totalorder %v1698_v7, 2 }
 0xd97   : > { %952 = vrot.lane.b32.xlu0 %v946_v57, %s1544_s19  ;;  %954 = vrot.lane.b32.xlu1 %v947_v59, %s1544_s19  ;;  %vm2972_vm9 = vmmov %vm2971_vm14 }
 0xd9b   : > { %958 = vrot.lane.b32.xlu0 %v946_v57, %s1545_s8  ;;  %960 = vrot.lane.b32.xlu1 %v947_v59, %s1545_s8 }
 0xe09   : > { %v953_v60 = vpop.permute.xlu0 %952  ;;  %v955_v62 = vpop.permute.xlu1 %954 }
 0xe0a   : > { %v956_v1 = vsel %vm2969_vm10, %v953_v60, %v955_v62  ;;  %v957_v2 = vsel %vm2970_vm12, %v955_v62, %v953_v60  ;;  %vm2527_vm10 = vmxor %vm2975_vm1, %vm2880_vm6  ;;  %vm2980_vm12 = vcmp.lt.s32.totalorder %v1698_v7, 1 }
 0xe0b   : > { %v2977_v18 = vsel %vm2527_vm10, 4294967295, %v2976_v18 }
 0xe0d   : > { %v959_v63 = vpop.permute.xlu0 %958  ;;  %v961_v0 = vpop.permute.xlu1 %960 }
 0xe0e   : > { %v962_v3 = vsel %vm2971_vm14, %v959_v63, %v961_v0  ;;  %v963_v4 = vsel %vm2972_vm9, %v961_v0, %v959_v63  ;;  %vm972_vm14 = vmxor %vm2921_vm7, %vm2880_vm6  ;;  %vm2978_vm9 = vcmp.lt.s32.totalorder %v1698_v7, 127 }
 0xe0f   : > { %v964_v11 = vsel %vm2968_vm3, %v956_v1, %v963_v4  ;;  %v965_v10 = vsel %vm2975_vm1, %v957_v2, %v962_v3  ;;  %vm2979_vm4 = vmmov %vm2978_vm9 }
 0xe10   : > { %v966_v22 = vmin.f32 %v946_v57, %v964_v11  ;;  %v967_v23 = vmin.f32 %v947_v59, %v965_v10  ;;  %v968_v24 = vmax.f32 %v946_v57, %v964_v11  ;;  %v969_v26 = vmax.f32 %v947_v59, %v965_v10 }
 0xe12   : > { %v970_v27 = vsel %vm2516_vm8, %v966_v22, %v968_v24  ;;  %v971_v29 = vsel %vm2527_vm10, %v967_v23, %v969_v26  ;;  %vm2981_vm8 = vmmov %vm2980_vm12 }
 0xe13   : > { %976 = vrot.lane.b32.xlu0 %v970_v27, %s1542_s21  ;;  %978 = vrot.lane.b32.xlu1 %v971_v29, %s1542_s21  ;;  %vm2551_vm10 = vmxor %vm972_vm14, %vm2880_vm6 }
 0xe14   : > { %v2983_v44 = vsel %vm2551_vm10, 4294967295, %v2982_v44 }
 0xe17   : > { %982 = vrot.lane.b32.xlu0 %v970_v27, %s1541_s17  ;;  %984 = vrot.lane.b32.xlu1 %v971_v29, %s1541_s17 }
 0xe85   : > { %v977_v30 = vpop.permute.xlu0 %976  ;;  %v979_v31 = vpop.permute.xlu1 %978 }
 0xe86   : > { %v980_v36 = vsel %vm2978_vm9, %v977_v30, %v979_v31  ;;  %v981_v38 = vsel %vm2979_vm4, %v979_v31, %v977_v30  ;;  %vm2562_vm9 = vmxor %vm2922_vm2, %vm2880_vm6  ;;  %vm2988_vm4 = vnez %v2928_v9 }
 0xe89   : > { %v983_v33 = vpop.permute.xlu0 %982  ;;  %v985_v34 = vpop.permute.xlu1 %984 }
 0xe8a   : > { %v986_v41 = vsel %vm2980_vm12, %v983_v33, %v985_v34  ;;  %v987_v42 = vsel %vm2981_vm8, %v985_v34, %v983_v33  ;;  %vm2986_vm8 = vcmp.lt.s32.totalorder %v1698_v7, 64  ;;  %vm1011_vm12 = vmxor %vm2988_vm4, %vm2880_vm6 }
 0xe8b   : > { %v988_v45 = vsel %vm2921_vm7, %v980_v36, %v987_v42  ;;  %v989_v46 = vsel %vm2922_vm2, %v981_v38, %v986_v41  ;;  %vm2987_vm14 = vmmov %vm2986_vm8 }
 0xe8c   : > { %v990_v48 = vmin.f32 %v970_v27, %v988_v45  ;;  %v991_v50 = vmin.f32 %v971_v29, %v989_v46  ;;  %v992_v51 = vmax.f32 %v970_v27, %v988_v45  ;;  %v993_v53 = vmax.f32 %v971_v29, %v989_v46 }
 0xe8e   : > { %v994_v54 = vsel %vm2551_vm10, %v990_v48, %v992_v51  ;;  %v995_v55 = vsel %vm2562_vm9, %v991_v50, %v993_v53 }
 0xe8f   : > { %v1005_v56 = vmax.f32 %v994_v54, %v995_v55  ;;  %v1004_v57 = vmin.f32 %v994_v54, %v995_v55 }
 0xe91   : > { %1014 = vrot.lane.b32.xlu1 %v1005_v56, %s1554_s28  ;;  %1012 = vrot.lane.b32.xlu0 %v1004_v57, %s1554_s28 }
 0xf03   : > { %v1015_v59 = vpop.permute.xlu1 %1014  ;;  %v1013_v60 = vpop.permute.xlu0 %1012 }
 0xf04   : > { %v1016_v62 = vsel %vm2986_vm8, %v1013_v60, %v1015_v59  ;;  %v1017_v63 = vsel %vm2987_vm14, %v1015_v59, %v1013_v60  ;;  %vm2989_vm8 = vnez %v2930_v21  ;;  %vm2992_vm14 = vcmp.lt.s32.totalorder %v1698_v7, 32 }
 0xf05   : > { %v1018_v0 = vsel %vm2168_vm0, %v1016_v62, %v1017_v63  ;;  %v1019_v1 = vsel %vm2172_vm5, %v1017_v63, %v1016_v62  ;;  %vm2990_vm0 = vcmp.lt.s32.totalorder %v1698_v7, 96  ;;  %vm2993_vm4 = vmmov %vm2992_vm14 }
 0xf06   : > { %v1020_v2 = vmin.f32 %v1004_v57, %v1018_v0  ;;  %v1021_v3 = vmin.f32 %v1005_v56, %v1019_v1  ;;  %v1022_v4 = vmax.f32 %v1004_v57, %v1018_v0  ;;  %v1023_v11 = vmax.f32 %v1005_v56, %v1019_v1  ;;  %vm2991_vm5 = vmmov %vm2990_vm0 }
 0xf08   : > { %v1025_v10 = vsel %vm1011_vm12, %v1021_v3, %v1023_v11  ;;  %v1024_v22 = vsel %vm2989_vm8, %v1020_v2, %v1022_v4  ;;  %vm2994_vm12 = vnez %v2873_v35  ;;  %vm2995_vm8 = vnez %v2940_v43 }
 0xf09   : > { %1032 = vrot.lane.b32.xlu1 %v1025_v10, %s1552_s27  ;;  %1030 = vrot.lane.b32.xlu0 %v1024_v22, %s1552_s27  ;;  %vm1029_vm10 = vmxor %vm2995_vm8, %vm2880_vm6  ;;  %vm3002_vm8 = vnez %v2946_v58 }
 0xf0d   : > { %1038 = vrot.lane.b32.xlu1 %v1025_v10, %s1553_s26  ;;  %1036 = vrot.lane.b32.xlu0 %v1024_v22, %s1553_s26 }
 0xf7b   : > { %v1033_v5 = vpop.permute.xlu1 %1032  ;;  %v1031_v14 = vpop.permute.xlu0 %1030 }
 0xf7c   : > { %v1034_v24 = vsel %vm2990_vm0, %v1031_v14, %v1033_v5  ;;  %v1035_v26 = vsel %vm2991_vm5, %v1033_v5, %v1031_v14  ;;  %vm2996_vm0 = vnez %v2937_v39 }
 0xf7f   : > { %v1039_v9 = vpop.permute.xlu1 %1038  ;;  %v1037_v23 = vpop.permute.xlu0 %1036 }
 0xf80   : > { %v1040_v21 = vsel %vm2992_vm14, %v1037_v23, %v1039_v9  ;;  %v1041_v27 = vsel %vm2993_vm4, %v1039_v9, %v1037_v23  ;;  %vm3001_vm4 = vnez %v2949_v61 }
 0xf81   : > { %v1042_v29 = vsel %vm2931_vm13, %v1034_v24, %v1041_v27  ;;  %v1043_v30 = vsel %vm2994_vm12, %v1035_v26, %v1040_v21  ;;  %vm2997_vm13 = vcmp.lt.s32.totalorder %v1698_v7, 112  ;;  %vm1053_vm12 = vmxor %vm3001_vm4, %vm2880_vm6 }
 0xf82   : > { %v1044_v31 = vmin.f32 %v1024_v22, %v1042_v29  ;;  %v1045_v33 = vmin.f32 %v1025_v10, %v1043_v30  ;;  %v1046_v34 = vmax.f32 %v1024_v22, %v1042_v29  ;;  %v1047_v36 = vmax.f32 %v1025_v10, %v1043_v30  ;;  %vm2998_vm5 = vmmov %vm2997_vm13 }
 0xf84   : > { %v1048_v38 = vsel %vm2996_vm0, %v1044_v31, %v1046_v34  ;;  %v1049_v41 = vsel %vm1029_vm10, %v1045_v33, %v1047_v36  ;;  %vm2999_vm10 = vcmp.lt.s32.totalorder %v1698_v7, 16  ;;  %vm3005_vm0 = vcmp.lt.s32.totalorder %v1698_v7, 8 }
 0xf85   : > { %1054 = vrot.lane.b32.xlu0 %v1048_v38, %s1550_s24  ;;  %1056 = vrot.lane.b32.xlu1 %v1049_v41, %s1550_s24  ;;  %vm3000_vm14 = vmmov %vm2999_vm10 }
 0xf89   : > { %1060 = vrot.lane.b32.xlu0 %v1048_v38, %s1551_s18  ;;  %1062 = vrot.lane.b32.xlu1 %v1049_v41, %s1551_s18 }
 0xff7   : > { %v1055_v32 = vpop.permute.xlu0 %1054  ;;  %v1057_v35 = vpop.permute.xlu1 %1056 }
 0xff8   : > { %v1058_v45 = vsel %vm2997_vm13, %v1055_v32, %v1057_v35  ;;  %v1059_v39 = vsel %vm2998_vm5, %v1057_v35, %v1055_v32  ;;  %vm3006_vm13 = vmmov %vm3005_vm0  ;;  %vm3007_vm5 = vnez %v2844_v12 }
 0xffb   : > { %v1061_v43 = vpop.permute.xlu0 %1060  ;;  %v1063_v42 = vpop.permute.xlu1 %1062 }
 0xffc   : > { %v1064_v46 = vsel %vm2999_vm10, %v1061_v43, %v1063_v42  ;;  %v1065_v48 = vsel %vm3000_vm14, %v1063_v42, %v1061_v43  ;;  %vm3008_vm10 = vnez %v2846_v17  ;;  %vm3009_vm14 = vnez %v2957_v28 }
 0xffd   : > { %v1066_v50 = vsel %vm2900_vm11, %v1058_v45, %v1065_v48  ;;  %v1067_v51 = vsel %vm2947_vm15, %v1059_v39, %v1064_v46  ;;  %vm3003_vm11 = vcmp.lt.s32.totalorder %v1698_v7, 120  ;;  %vm1077_vm4 = vmxor %vm3009_vm14, %vm2880_vm6 }
 0xffe   : > { %v1068_v53 = vmin.f32 %v1048_v38, %v1066_v50  ;;  %v1069_v54 = vmin.f32 %v1049_v41, %v1067_v51  ;;  %v1070_v55 = vmax.f32 %v1048_v38, %v1066_v50  ;;  %v1071_v56 = vmax.f32 %v1049_v41, %v1067_v51  ;;  %vm3004_vm15 = vmmov %vm3003_vm11 }
0x1000   : > { %v1072_v57 = vsel %vm3002_vm8, %v1068_v53, %v1070_v55  ;;  %v1073_v59 = vsel %vm1053_vm12, %v1069_v54, %v1071_v56  ;;  %vm3010_vm12 = vnez %v2955_v25  ;;  %vm3011_vm8 = vcmp.lt.s32.totalorder %v1698_v7, 124 }
0x1001   : > { %1078 = vrot.lane.b32.xlu0 %v1072_v57, %s1548_s22  ;;  %1080 = vrot.lane.b32.xlu1 %v1073_v59, %s1548_s22 }
0x1005   : > { %1084 = vrot.lane.b32.xlu0 %v1072_v57, %s1549_s23  ;;  %1086 = vrot.lane.b32.xlu1 %v1073_v59, %s1549_s23 }
0x1073   : > { %v1079_v6 = vpop.permute.xlu0 %1078  ;;  %v1081_v13 = vpop.permute.xlu1 %1080 }
0x1074   : > { %v1082_v62 = vsel %vm3003_vm11, %v1079_v6, %v1081_v13  ;;  %v1083_v58 = vsel %vm3004_vm15, %v1081_v13, %v1079_v6  ;;  %vm3012_vm11 = vmmov %vm3011_vm8  ;;  %vm3013_vm15 = vcmp.lt.s32.totalorder %v1698_v7, 4 }
0x1077   : > { %v1085_v61 = vpop.permute.xlu0 %1084  ;;  %v1087_v60 = vpop.permute.xlu1 %1086 }
0x1078   : > { %v1088_v63 = vsel %vm3005_vm0, %v1085_v61, %v1087_v60  ;;  %v1089_v0 = vsel %vm3006_vm13, %v1087_v60, %v1085_v61  ;;  %vm3014_vm0 = vmmov %vm3013_vm15  ;;  %vm3015_vm13 = vnez %v2840_v37 }
0x1079   : > { %v1090_v1 = vsel %vm3007_vm5, %v1082_v62, %v1089_v0  ;;  %v1091_v2 = vsel %vm3008_vm10, %v1083_v58, %v1088_v63  ;;  %vm3016_vm5 = vnez %v2842_v40  ;;  %vm3017_vm10 = vnez %v2967_v52 }
0x107a   : > { %v1092_v3 = vmin.f32 %v1072_v57, %v1090_v1  ;;  %v1093_v4 = vmin.f32 %v1073_v59, %v1091_v2  ;;  %v1094_v11 = vmax.f32 %v1072_v57, %v1090_v1  ;;  %v1095_v10 = vmax.f32 %v1073_v59, %v1091_v2  ;;  %vm1101_vm14 = vmxor %vm3017_vm10, %vm2880_vm6 }
0x107b   : > { %vm3027_vm10 = vcmp.lt.s32.totalorder %v1698_v7, 1 }
0x107c   : > { %v1096_v22 = vsel %vm3010_vm12, %v1092_v3, %v1094_v11  ;;  %v1097_v5 = vsel %vm1077_vm4, %v1093_v4, %v1095_v10  ;;  %vm3018_vm4 = vnez %v2964_v49  ;;  %vm3019_vm12 = vcmp.lt.s32.totalorder %v1698_v7, 126 }
0x107d   : > { %1102 = vrot.lane.b32.xlu0 %v1096_v22, %s1546_s15  ;;  %1104 = vrot.lane.b32.xlu1 %v1097_v5, %s1546_s15  ;;  %s1452_s15 = scalar_lea.vmem %s1193_s7, 128 }
0x107e   : > { %p1453_p1 = scmp.ne.s32.totalorder %s1193_s7, %s1452_s15 }
0x1080   : > { %p1454_p8 = pnand %p1453_p1, %p1657_p0 }
0x1081   : > { %1108 = vrot.lane.b32.xlu0 %v1096_v22, %s1547_s16  ;;  %1110 = vrot.lane.b32.xlu1 %v1097_v5, %s1547_s16  ;;  %s1458_s16 = scalar_lea.vmem %s1457_s4, 256 }
0x1082   : > { %p1455_p13 = pneg %p1454_p8  ;;  %p1460_p2 = scmp.lt.s32.totalorder %s1458_s16, %s1452_s15 }
0x1084   : > { %p1461_p12 = por %p1460_p2, %p1459_p11 }
0x1086   : > { %p1462_p3 = pnand %p1461_p12, %p1455_p13 }
0x10ef   : > { %v1103_v12 = vpop.permute.xlu0 %1102  ;;  %v1105_v17 = vpop.permute.xlu1 %1104 }
0x10f0   : > { %v1106_v9 = vsel %vm3011_vm8, %v1103_v12, %v1105_v17  ;;  %v1107_v25 = vsel %vm3012_vm11, %v1105_v17, %v1103_v12  ;;  %vm3020_vm8 = vmmov %vm3019_vm12  ;;  %vm3021_vm11 = vcmp.lt.s32.totalorder %v1698_v7, 2 }
0x10f3   : > { %v1109_v28 = vpop.permute.xlu0 %1108  ;;  %v1111_v14 = vpop.permute.xlu1 %1110 }
0x10f4   : > { %v1112_v23 = vsel %vm3013_vm15, %v1109_v28, %v1111_v14  ;;  %v1113_v24 = vsel %vm3014_vm0, %v1111_v14, %v1109_v28  ;;  %vm3022_vm15 = vmmov %vm3021_vm11  ;;  %vm3023_vm0 = vnez %v2977_v18 }
0x10f5   : > { %v1114_v26 = vsel %vm3015_vm13, %v1106_v9, %v1113_v24  ;;  %v1115_v21 = vsel %vm3016_vm5, %v1107_v25, %v1112_v23  ;;  %vm1125_vm13 = vmxor %vm3023_vm0, %vm2880_vm6  ;;  %vm3024_vm5 = vnez %v2974_v8 }
0x10f6   : > { %v1116_v27 = vmin.f32 %v1096_v22, %v1114_v26  ;;  %v1117_v29 = vmin.f32 %v1097_v5, %v1115_v21  ;;  %v1118_v30 = vmax.f32 %v1096_v22, %v1114_v26  ;;  %v1119_v31 = vmax.f32 %v1097_v5, %v1115_v21 }
0x10f8   : > { %v1120_v33 = vsel %vm3018_vm4, %v1116_v27, %v1118_v30  ;;  %v1121_v34 = vsel %vm1101_vm14, %v1117_v29, %v1119_v31  ;;  %vm3028_vm14 = vmmov %vm3027_vm10 }
0x10f9   : > { %1126 = vrot.lane.b32.xlu0 %v1120_v33, %s1544_s19  ;;  %1128 = vrot.lane.b32.xlu1 %v1121_v34, %s1544_s19  ;;  %vm1149_vm4 = vmxor %vm2562_vm9, %vm2880_vm6  ;;  %s1190_s19 = scalar_lea.hbm %s2755_s2, %s1308_s29 }
0x10fd   : > { %1132 = vrot.lane.b32.xlu0 %v1120_v33, %s1545_s8  ;;  %1134 = vrot.lane.b32.xlu1 %v1121_v34, %s1545_s8  ;;  %s1176_s8 = scalar_lea.sflag [#allocation4], %s1684_s30 }
0x116b   : > { %v1127_v37 = vpop.permute.xlu0 %1126  ;;  %v1129_v40 = vpop.permute.xlu1 %1128 }
0x116c   : > { %v1130_v38 = vsel %vm3019_vm12, %v1127_v37, %v1129_v40  ;;  %v1131_v49 = vsel %vm3020_vm8, %v1129_v40, %v1127_v37  ;;  %vm3029_vm12 = vnez %v2983_v44 }
0x116f   : > { %v1133_v52 = vpop.permute.xlu0 %1132  ;;  %v1135_v36 = vpop.permute.xlu1 %1134 }
0x1170   : > { %v1136_v41 = vsel %vm3021_vm11, %v1133_v52, %v1135_v36  ;;  %v1137_v32 = vsel %vm3022_vm15, %v1135_v36, %v1133_v52 }
0x1171   : > { %v1138_v35 = vsel %vm2968_vm3, %v1130_v38, %v1137_v32  ;;  %v1139_v43 = vsel %vm2975_vm1, %v1131_v49, %v1136_v41  ;;  %vm3025_vm1 = vcmp.lt.s32.totalorder %v1698_v7, 127 }
0x1172   : > { %v1140_v42 = vmin.f32 %v1120_v33, %v1138_v35  ;;  %v1141_v45 = vmin.f32 %v1121_v34, %v1139_v43  ;;  %v1142_v39 = vmax.f32 %v1120_v33, %v1138_v35  ;;  %v1143_v46 = vmax.f32 %v1121_v34, %v1139_v43  ;;  %vm3026_vm3 = vmmov %vm3025_vm1 }
0x1174   : > { %v1144_v48 = vsel %vm3024_vm5, %v1140_v42, %v1142_v39  ;;  %v1145_v50 = vsel %vm1125_vm13, %v1141_v45, %v1143_v46 }
0x1175   : > { %1150 = vrot.lane.b32.xlu0 %v1144_v48, %s1542_s21  ;;  %1152 = vrot.lane.b32.xlu1 %v1145_v50, %s1542_s21 }
0x1179   : > { %1156 = vrot.lane.b32.xlu0 %v1144_v48, %s1541_s17  ;;  %1158 = vrot.lane.b32.xlu1 %v1145_v50, %s1541_s17 }
0x11e7   : > { %v1151_v16 = vpop.permute.xlu0 %1150  ;;  %v1153_v20 = vpop.permute.xlu1 %1152 }
0x11e8   : > { %v1154_v53 = vsel %vm3025_vm1, %v1151_v16, %v1153_v20  ;;  %v1155_v8 = vsel %vm3026_vm3, %v1153_v20, %v1151_v16 }
0x11eb   : > { %v1157_v18 = vpop.permute.xlu0 %1156  ;;  %v1159_v51 = vpop.permute.xlu1 %1158 }
0x11ec   : > { %v1160_v54 = vsel %vm3027_vm10, %v1157_v18, %v1159_v51  ;;  %v1161_v55 = vsel %vm3028_vm14, %v1159_v51, %v1157_v18 }
0x11ed   : > { %v1162_v56 = vsel %vm2921_vm7, %v1154_v53, %v1161_v55  ;;  %v1163_v57 = vsel %vm2922_vm2, %v1155_v8, %v1160_v54 }
0x11ee   : > { %v1164_v59 = vmin.f32 %v1144_v48, %v1162_v56  ;;  %v1165_v6 = vmin.f32 %v1145_v50, %v1163_v57  ;;  %v1166_v13 = vmax.f32 %v1144_v48, %v1162_v56  ;;  %v1167_v61 = vmax.f32 %v1145_v50, %v1163_v57 }
0x11f0   : > { %v1168_v7 = vsel %vm3029_vm12, %v1164_v59, %v1166_v13  ;;  %v1169_v47 = vsel %vm1149_vm4, %v1165_v6, %v1167_v61 }
0x11f1   : > { %v1172_v60 = vcombine.low %v1168_v7, %v1169_v47 }
0x11f3   : > { %1174 = vst [vmem:[%s193_s6] sm:$0xff] %v1172_v60 }
0x11f4   : > { %1465 = shalt.err (!%p1462_p3)
}
0x11f5   : > { %s1466_s22 = scalar_lea.hbm %s1190_s19, 128  ;;  %s1470_s24 = scalar_lea.hbm %s2755_s2, 256 }
0x11f6   : > { %p1467_p5 = scmp.ne.s32.totalorder %s1190_s19, %s1466_s22  ;;  %p1471_p4 = scmp.lt.s32.totalorder %s1190_s19, %s2755_s2 }
0x11f7   : > { %p1472_p10 = scmp.lt.s32.totalorder %s1470_s24, %s1466_s22 }
0x11f8   : > { %p1468_p7 = pnand %p1467_p5, %p1657_p0 }
0x11f9   : > { %p1473_p9 = por %p1472_p10, %p1471_p4 }
0x11fa   : > { %p1469_p6 = pneg %p1468_p7 }
0x11fc   : > { %p1474_p1 = pnand %p1473_p9, %p1469_p6 }
0x11fe   : > { %1477 = shalt.err (!%p1474_p1)
}
0x11ff   : > { %1315 = dma.vmem_to_hbm [thread:$0]  (%p1657_p0), %s1193_s7, 128, %s1190_s19, %s1176_s8  }
0x1200 PF: > { %s1204_s26 = sand.u32 1, %s1516_s9   ;;  %p3030_p8 = scmp.ne.s32.totalorder %s2825_s20, 0 }
0x1201   : > { %p3031_p13 = scmp.ge.s32.totalorder %s1536_s14, 2  ;;  %s1205_s28 = scalar_lea.sflag [#allocation4], %s1204_s26 }
0x1203   : > { %p1326_p11 = pnand %p3031_p13, %p3030_p8 }
0x1205   : > { %p1327_p2 = pneg %p1326_p11 }
0x1207   : > { %1511 = dma.done.wait (%p1327_p2), %s1205_s28, 128  }
0x1208   : > { %1513 = vsyncadd (%p1327_p2), %s1205_s28, 4294967168  ;;  %s19_s14 = sadd.s32 1, %s1536_s14   ;;  %s3032_s9 = smov %s1520_s10 }
0x1209   : > { %p16_p12 = scmp.ge.s32.totalorder %s19_s14, 4   ;;  %s3033_s10 = smov %s1524_s11 }
0x120a   : > { %s3034_s11 = smov %s1663_s5  ;;  %s3035_s12 = smov %s1532_s13 }
0x120b   : > { %s3036_s13 = smov %s3038_s25  ;;  %18 = sbr.rel (!%p16_p12) target bundleno = 7 (0x7), region = 79 }
0x1210   :  { %1210 = vsyncpa [#allocation3], 1 }
0x1211   :  { %1212 = vsyncpa [#allocation3 + $0x1], 1 }
0x1212   :  { %1213 = vsyncpa [#allocation6], 1 }
0x1213   :  { %1215 = vsyncpa [#allocation6 + $0x1], 1 }
0x1214   :  { %1216 = vsyncpa [#allocation4], 1 }
0x1215   :  { %1218 = vsyncpa [#allocation4 + $0x1], 1 }

</bundles_post_ra>
